<compile_context>
chip_gen: v7x
topology: tpu7x:2x2x1
jax: 0.10.0
libtpu: 0.0.40
codegen_flags: <defaults>
</compile_context>

<pallas_src>
import jax
import jax.numpy as jnp
from jax.experimental import pallas as pl
from jax.experimental.pallas import tpu as pltpu

# Padded layer dims used inside the kernel (last dims are multiples of 128).
K_IN = 896        # 784 -> 7*128
D1, D2, D3 = 512, 256, 128
D4 = 128          # 64  -> 128 (zero-padded weights/bias)
D_OUT = 128       # 10  -> 128 (pad logits driven to -1e30)
TILE_B_MAX = 256  # batch tile: safe for v5e 16MiB scoped .. v7x 64MiB physical
NEG_INF = -1e30


def _mlp_kernel(x_ref,
                w1_ref, b1_ref, w2_ref, b2_ref, w3_ref, b3_ref,
                w4_ref, b4_ref, w5_ref, b5_ref,
                o_ref):
    """Fused 5-layer MLP + log_softmax on one batch tile.

    Activations stay f32; they are cast to bf16 only at each MXU input and
    accumulated in f32 via preferred_element_type.
    """
    def dense(h, w_ref, b_ref, relu):
        acc = jnp.dot(h.astype(jnp.bfloat16), w_ref[...],
                      preferred_element_type=jnp.float32) + b_ref[...]
        return jnp.maximum(acc, 0.0) if relu else acc

    h = x_ref[...]
    h = dense(h, w1_ref, b1_ref, True)
    h = dense(h, w2_ref, b2_ref, True)
    h = dense(h, w3_ref, b3_ref, True)
    h = dense(h, w4_ref, b4_ref, True)
    logits = dense(h, w5_ref, b5_ref, False)   # pad lanes ~ -1e30

    # Numerically stable log_softmax over the 128 padded lanes; pad lanes
    # contribute exp(-huge) == 0, so this equals a 10-wide log_softmax.
    m = jnp.max(logits, axis=-1, keepdims=True)
    shifted = logits - m
    lse = jnp.log(jnp.sum(jnp.exp(shifted), axis=-1, keepdims=True))
    o_ref[...] = (shifted - lse).astype(o_ref.dtype)


def init_params(key):
    """PyTorch nn.Linear-style init. Weights [in, out], biases [1, out], f32."""
    dims = [(784, 512), (512, 256), (256, 128), (128, 64), (64, 10)]
    params = []
    for fan_in, fan_out in dims:
        kw, kb, key = jax.random.split(key, 3)
        bound = 1.0 / (fan_in ** 0.5)
        w = jax.random.uniform(kw, (fan_in, fan_out), jnp.float32, -bound, bound)
        b = jax.random.uniform(kb, (1, fan_out), jnp.float32, -bound, bound)
        params += [w, b]
    return params


def prepare_params(params):
    """Pad to lane-aligned shapes and cast weights to bf16 for the kernel."""
    w1, b1, w2, b2, w3, b3, w4, b4, w5, b5 = params
    w1p = jnp.pad(w1, ((0, K_IN - 784), (0, 0)))          # zero K-pad
    w4p = jnp.pad(w4, ((0, 0), (0, D4 - 64)))             # zero out-pad
    b4p = jnp.pad(b4, ((0, 0), (0, D4 - 64)))             # pad activations -> 0
    w5p = jnp.pad(w5, ((0, D4 - 64), (0, D_OUT - 10)))    # zero pad
    b5p = jnp.pad(b5, ((0, 0), (0, D_OUT - 10)),
                  constant_values=NEG_INF)                 # mask pad logits
    ws = [w.astype(jnp.bfloat16) for w in (w1p, w2, w3, w4p, w5p)]
    bs = [b1, b2, b3, b4p, b5p]                            # biases stay f32
    prepared = []
    for w, b in zip(ws, bs):
        prepared += [w, b]
    return prepared


def _round_up(n, m):
    return ((n + m - 1) // m) * m


@jax.jit
def fully_connected_net(x, *prepared_params):
    """x: [B, 1, 28, 28] (NCHW) or anything with 784 trailing elems per row."""
    batch = x.shape[0]
    x2d = x.reshape(batch, 784).astype(jnp.float32)

    # Batch grid: sublane-aligned tile, capped at 256 rows so double-buffered
    # activation tiles + VMEM-resident weights fit every TPU generation.
    tile_b = min(TILE_B_MAX, _round_up(batch, 8))
    b_pad = _round_up(batch, tile_b)
    grid = (b_pad // tile_b,)

    x2d = jnp.pad(x2d, ((0, b_pad - batch), (0, K_IN - 784)))

    # Activations/output march with the batch grid; weights & biases use a
    # constant block index so they are DMA'd once and stay VMEM-resident.
    const_map = lambda i: (0, 0)
    in_specs = [pl.BlockSpec((tile_b, K_IN), lambda i: (i, 0))]
    for w, b in zip(prepared_params[0::2], prepared_params[1::2]):
        in_specs.append(pl.BlockSpec(w.shape, const_map))
        in_specs.append(pl.BlockSpec(b.shape, const_map))
    out_spec = pl.BlockSpec((tile_b, D_OUT), lambda i: (i, 0))

    flops = 2 * b_pad * (K_IN * D1 + D1 * D2 + D2 * D3 + D3 * D4 + D4 * D_OUT)
    weight_bytes = 2 * (K_IN * D1 + D1 * D2 + D2 * D3 + D3 * D4 + D4 * D_OUT)
    bias_bytes = 4 * (D1 + D2 + D3 + D4 + D_OUT)
    io_bytes = 4 * b_pad * (K_IN + D_OUT)
    cost = pl.CostEstimate(flops=flops,
                           transcendentals=b_pad * (D_OUT + 1),
                           bytes_accessed=weight_bytes + bias_bytes + io_bytes)

    # TODO(synk): nn.Dropout(p=0.2) is defined but never applied in forward(),
    # so it is intentionally omitted here.
    out = pl.pallas_call(
        _mlp_kernel,
        out_shape=jax.ShapeDtypeStruct((b_pad, D_OUT), jnp.float32),
        grid_spec=pltpu.PrefetchScalarGridSpec(
            num_scalar_prefetch=0,
            grid=grid,
            in_specs=in_specs,
            out_specs=out_spec),
        compiler_params=pltpu.CompilerParams(
            dimension_semantics=("parallel",)),  # shard batch across v7x TCs
        cost_estimate=cost,
    )(x2d, *prepared_params)

    # Lane-dense (.., 128) output inside the kernel; slice back to the real
    # 10 classes and real batch rows outside.
    return out[:batch, :10]


if __name__ == "__main__":
    key = jax.random.PRNGKey(0)
    pkey, xkey = jax.random.split(key)

    raw_params = init_params(pkey)
    params = prepare_params(raw_params)

    x = jax.random.normal(xkey, (8, 1, 28, 28), jnp.float32)

    out = fully_connected_net(x, *params)
    out = jax.block_until_ready(out)

    # Pure-JAX f32 reference (unpadded weights); bf16 kernel weights give
    # ~1e-3-scale differences at this init scale.
    def ref_forward(xv, p):
        w1, b1, w2, b2, w3, b3, w4, b4, w5, b5 = p
        h = xv.reshape(xv.shape[0], 784)
        h = jnp.maximum(h @ w1 + b1, 0.0)
        h = jnp.maximum(h @ w2 + b2, 0.0)
        h = jnp.maximum(h @ w3 + b3, 0.0)
        h = jnp.maximum(h @ w4 + b4, 0.0)
        return jax.nn.log_softmax(h @ w5 + b5, axis=1)

    ref = ref_forward(x, raw_params)

    assert out.shape == (8, 10)
    row_sums = jnp.sum(jnp.exp(out), axis=1)
    assert bool(jnp.all(jnp.abs(row_sums - 1.0) < 1e-4))
    assert bool(jnp.max(jnp.abs(out - ref)) < 5e-2)

    print("KERNEL_OK")
</pallas_src>

<mosaic_0001>
module attributes {stable_mosaic.version = 11 : i64} {
  func.func @_mlp_kernel(%arg0: i32, %arg1: memref<8x896xf32, #tpu.memory_space<vmem>>, %arg2: memref<896x512xbf16, #tpu.memory_space<vmem>>, %arg3: memref<1x512xf32, #tpu.memory_space<vmem>>, %arg4: memref<512x256xbf16, #tpu.memory_space<vmem>>, %arg5: memref<1x256xf32, #tpu.memory_space<vmem>>, %arg6: memref<256x128xbf16, #tpu.memory_space<vmem>>, %arg7: memref<1x128xf32, #tpu.memory_space<vmem>>, %arg8: memref<128x128xbf16, #tpu.memory_space<vmem>>, %arg9: memref<1x128xf32, #tpu.memory_space<vmem>>, %arg10: memref<128x128xbf16, #tpu.memory_space<vmem>>, %arg11: memref<1x128xf32, #tpu.memory_space<vmem>>, %arg12: memref<8x128xf32, #tpu.memory_space<vmem>>) attributes {dimension_semantics = [#tpu.dimension_semantics<parallel>], iteration_bounds = array<i64: 1>, scalar_prefetch = 0 : i64, scratch_operands = 0 : i64, tpu.core_type = #tpu.core_type<tc>, window_params = [{transform_indices = @transform_0, window_bounds = array<i64: 8, 896>}, {pipeline_mode = #tpu.pipeline_mode<synchronous>, transform_indices = @transform_1, window_bounds = array<i64: 896, 512>}, {pipeline_mode = #tpu.pipeline_mode<synchronous>, transform_indices = @transform_2, window_bounds = array<i64: 1, 512>}, {pipeline_mode = #tpu.pipeline_mode<synchronous>, transform_indices = @transform_3, window_bounds = array<i64: 512, 256>}, {pipeline_mode = #tpu.pipeline_mode<synchronous>, transform_indices = @transform_4, window_bounds = array<i64: 1, 256>}, {pipeline_mode = #tpu.pipeline_mode<synchronous>, transform_indices = @transform_5, window_bounds = array<i64: 256, 128>}, {pipeline_mode = #tpu.pipeline_mode<synchronous>, transform_indices = @transform_6, window_bounds = array<i64: 1, 128>}, {pipeline_mode = #tpu.pipeline_mode<synchronous>, transform_indices = @transform_7, window_bounds = array<i64: 128, 128>}, {pipeline_mode = #tpu.pipeline_mode<synchronous>, transform_indices = @transform_8, window_bounds = array<i64: 1, 128>}, {pipeline_mode = #tpu.pipeline_mode<synchronous>, transform_indices = @transform_9, window_bounds = array<i64: 128, 128>}, {pipeline_mode = #tpu.pipeline_mode<synchronous>, transform_indices = @transform_10, window_bounds = array<i64: 1, 128>}, {transform_indices = @transform_11, window_bounds = array<i64: 8, 128>}]} {
    %c0 = arith.constant 0 : index
    %c0_0 = arith.constant 0 : index
    %0 = vector.load %arg1[%c0, %c0_0] : memref<8x896xf32, #tpu.memory_space<vmem>>, vector<8x896xf32>
    %1 = arith.truncf %0 : vector<8x896xf32> to vector<8x896xbf16>
    %c0_1 = arith.constant 0 : index
    %c0_2 = arith.constant 0 : index
    %2 = vector.load %arg2[%c0_1, %c0_2] : memref<896x512xbf16, #tpu.memory_space<vmem>>, vector<896x512xbf16>
    %cst = arith.constant dense<0.000000e+00> : vector<8x512xf32>
    %3 = tpu.matmul %1, %2, %cst {dimension_numbers = #tpu.dot_dimension_numbers<[1], [0], [0], [1], [0, 0, 1, 1], [], []>} : vector<8x896xbf16>, vector<896x512xbf16>, vector<8x512xf32> -> vector<8x512xf32>
    %c0_3 = arith.constant 0 : index
    %c0_4 = arith.constant 0 : index
    %4 = vector.load %arg3[%c0_3, %c0_4] : memref<1x512xf32, #tpu.memory_space<vmem>>, vector<1x512xf32>
    %5 = vector.broadcast %4 : vector<1x512xf32> to vector<8x512xf32>
    %6 = arith.addf %3, %5 : vector<8x512xf32>
    %cst_5 = arith.constant 0.000000e+00 : f32
    %7 = vector.broadcast %cst_5 : f32 to vector<8x512xf32>
    %8 = arith.maximumf %6, %7 : vector<8x512xf32>
    %9 = arith.truncf %8 : vector<8x512xf32> to vector<8x512xbf16>
    %c0_6 = arith.constant 0 : index
    %c0_7 = arith.constant 0 : index
    %10 = vector.load %arg4[%c0_6, %c0_7] : memref<512x256xbf16, #tpu.memory_space<vmem>>, vector<512x256xbf16>
    %cst_8 = arith.constant dense<0.000000e+00> : vector<8x256xf32>
    %11 = tpu.matmul %9, %10, %cst_8 {dimension_numbers = #tpu.dot_dimension_numbers<[1], [0], [0], [1], [0, 0, 1, 1], [], []>} : vector<8x512xbf16>, vector<512x256xbf16>, vector<8x256xf32> -> vector<8x256xf32>
    %c0_9 = arith.constant 0 : index
    %c0_10 = arith.constant 0 : index
    %12 = vector.load %arg5[%c0_9, %c0_10] : memref<1x256xf32, #tpu.memory_space<vmem>>, vector<1x256xf32>
    %13 = vector.broadcast %12 : vector<1x256xf32> to vector<8x256xf32>
    %14 = arith.addf %11, %13 : vector<8x256xf32>
    %cst_11 = arith.constant 0.000000e+00 : f32
    %15 = vector.broadcast %cst_11 : f32 to vector<8x256xf32>
    %16 = arith.maximumf %14, %15 : vector<8x256xf32>
    %17 = arith.truncf %16 : vector<8x256xf32> to vector<8x256xbf16>
    %c0_12 = arith.constant 0 : index
    %c0_13 = arith.constant 0 : index
    %18 = vector.load %arg6[%c0_12, %c0_13] : memref<256x128xbf16, #tpu.memory_space<vmem>>, vector<256x128xbf16>
    %cst_14 = arith.constant dense<0.000000e+00> : vector<8x128xf32>
    %19 = tpu.matmul %17, %18, %cst_14 {dimension_numbers = #tpu.dot_dimension_numbers<[1], [0], [0], [1], [0, 0, 1, 1], [], []>} : vector<8x256xbf16>, vector<256x128xbf16>, vector<8x128xf32> -> vector<8x128xf32>
    %c0_15 = arith.constant 0 : index
    %c0_16 = arith.constant 0 : index
    %20 = vector.load %arg7[%c0_15, %c0_16] : memref<1x128xf32, #tpu.memory_space<vmem>>, vector<1x128xf32>
    %21 = vector.broadcast %20 : vector<1x128xf32> to vector<8x128xf32>
    %22 = arith.addf %19, %21 : vector<8x128xf32>
    %cst_17 = arith.constant 0.000000e+00 : f32
    %23 = vector.broadcast %cst_17 : f32 to vector<8x128xf32>
    %24 = arith.maximumf %22, %23 : vector<8x128xf32>
    %25 = arith.truncf %24 : vector<8x128xf32> to vector<8x128xbf16>
    %c0_18 = arith.constant 0 : index
    %c0_19 = arith.constant 0 : index
    %26 = vector.load %arg8[%c0_18, %c0_19] : memref<128x128xbf16, #tpu.memory_space<vmem>>, vector<128x128xbf16>
    %cst_20 = arith.constant dense<0.000000e+00> : vector<8x128xf32>
    %27 = tpu.matmul %25, %26, %cst_20 {dimension_numbers = #tpu.dot_dimension_numbers<[1], [0], [0], [1], [0, 0, 1, 1], [], []>} : vector<8x128xbf16>, vector<128x128xbf16>, vector<8x128xf32> -> vector<8x128xf32>
    %c0_21 = arith.constant 0 : index
    %c0_22 = arith.constant 0 : index
    %28 = vector.load %arg9[%c0_21, %c0_22] : memref<1x128xf32, #tpu.memory_space<vmem>>, vector<1x128xf32>
    %29 = vector.broadcast %28 : vector<1x128xf32> to vector<8x128xf32>
    %30 = arith.addf %27, %29 : vector<8x128xf32>
    %cst_23 = arith.constant 0.000000e+00 : f32
    %31 = vector.broadcast %cst_23 : f32 to vector<8x128xf32>
    %32 = arith.maximumf %30, %31 : vector<8x128xf32>
    %33 = arith.truncf %32 : vector<8x128xf32> to vector<8x128xbf16>
    %c0_24 = arith.constant 0 : index
    %c0_25 = arith.constant 0 : index
    %34 = vector.load %arg10[%c0_24, %c0_25] : memref<128x128xbf16, #tpu.memory_space<vmem>>, vector<128x128xbf16>
    %cst_26 = arith.constant dense<0.000000e+00> : vector<8x128xf32>
    %35 = tpu.matmul %33, %34, %cst_26 {dimension_numbers = #tpu.dot_dimension_numbers<[1], [0], [0], [1], [0, 0, 1, 1], [], []>} : vector<8x128xbf16>, vector<128x128xbf16>, vector<8x128xf32> -> vector<8x128xf32>
    %c0_27 = arith.constant 0 : index
    %c0_28 = arith.constant 0 : index
    %36 = vector.load %arg11[%c0_27, %c0_28] : memref<1x128xf32, #tpu.memory_space<vmem>>, vector<1x128xf32>
    %37 = vector.broadcast %36 : vector<1x128xf32> to vector<8x128xf32>
    %38 = arith.addf %35, %37 : vector<8x128xf32>
    %cst_29 = arith.constant dense<0xFF800000> : vector<8xf32>
    %39 = vector.multi_reduction <maximumf>, %38, %cst_29 [1] : vector<8x128xf32> to vector<8xf32>
    %40 = vector.shape_cast %39 : vector<8xf32> to vector<8x1xf32>
    %41 = vector.broadcast %40 : vector<8x1xf32> to vector<8x128xf32>
    %42 = arith.subf %38, %41 : vector<8x128xf32>
    %43 = math.exp %42 : vector<8x128xf32>
    %cst_30 = arith.constant dense<0.000000e+00> : vector<8xf32>
    %44 = vector.multi_reduction <add>, %43, %cst_30 [1] : vector<8x128xf32> to vector<8xf32>
    %45 = vector.shape_cast %44 : vector<8xf32> to vector<8x1xf32>
    %46 = math.log %45 : vector<8x1xf32>
    %47 = vector.broadcast %46 : vector<8x1xf32> to vector<8x128xf32>
    %48 = arith.subf %42, %47 : vector<8x128xf32>
    %c0_31 = arith.constant 0 : index
    %c0_32 = arith.constant 0 : index
    %49 = vector.load %arg12[%c0_31, %c0_32] : memref<8x128xf32, #tpu.memory_space<vmem>>, vector<8x128xf32>
    tpu.vector_store %arg12[%c0_31, %c0_32], %48 {strides = array<i32>} : memref<8x128xf32, #tpu.memory_space<vmem>>, vector<8x128xf32>,
    return
  }
  func.func @transform_0(%arg0: i32) -> (i32, i32) {
    %c0_i32 = arith.constant 0 : i32
    %c0_i32_0 = arith.constant 0 : i32
    return %arg0, %c0_i32 : i32, i32
  }
  func.func @transform_1(%arg0: i32) -> (i32, i32) {
    %c0_i32 = arith.constant 0 : i32
    %c0_i32_0 = arith.constant 0 : i32
    %c0_i32_1 = arith.constant 0 : i32
    return %c0_i32, %c0_i32_0 : i32, i32
  }
  func.func @transform_2(%arg0: i32) -> (i32, i32) {
    %c0_i32 = arith.constant 0 : i32
    %c0_i32_0 = arith.constant 0 : i32
    %c0_i32_1 = arith.constant 0 : i32
    return %c0_i32, %c0_i32_0 : i32, i32
  }
  func.func @transform_3(%arg0: i32) -> (i32, i32) {
    %c0_i32 = arith.constant 0 : i32
    %c0_i32_0 = arith.constant 0 : i32
    %c0_i32_1 = arith.constant 0 : i32
    return %c0_i32, %c0_i32_0 : i32, i32
  }
  func.func @transform_4(%arg0: i32) -> (i32, i32) {
    %c0_i32 = arith.constant 0 : i32
    %c0_i32_0 = arith.constant 0 : i32
    %c0_i32_1 = arith.constant 0 : i32
    return %c0_i32, %c0_i32_0 : i32, i32
  }
  func.func @transform_5(%arg0: i32) -> (i32, i32) {
    %c0_i32 = arith.constant 0 : i32
    %c0_i32_0 = arith.constant 0 : i32
    %c0_i32_1 = arith.constant 0 : i32
    return %c0_i32, %c0_i32_0 : i32, i32
  }
  func.func @transform_6(%arg0: i32) -> (i32, i32) {
    %c0_i32 = arith.constant 0 : i32
    %c0_i32_0 = arith.constant 0 : i32
    %c0_i32_1 = arith.constant 0 : i32
    return %c0_i32, %c0_i32_0 : i32, i32
  }
  func.func @transform_7(%arg0: i32) -> (i32, i32) {
    %c0_i32 = arith.constant 0 : i32
    %c0_i32_0 = arith.constant 0 : i32
    %c0_i32_1 = arith.constant 0 : i32
    return %c0_i32, %c0_i32_0 : i32, i32
  }
  func.func @transform_8(%arg0: i32) -> (i32, i32) {
    %c0_i32 = arith.constant 0 : i32
    %c0_i32_0 = arith.constant 0 : i32
    %c0_i32_1 = arith.constant 0 : i32
    return %c0_i32, %c0_i32_0 : i32, i32
  }
  func.func @transform_9(%arg0: i32) -> (i32, i32) {
    %c0_i32 = arith.constant 0 : i32
    %c0_i32_0 = arith.constant 0 : i32
    %c0_i32_1 = arith.constant 0 : i32
    return %c0_i32, %c0_i32_0 : i32, i32
  }
  func.func @transform_10(%arg0: i32) -> (i32, i32) {
    %c0_i32 = arith.constant 0 : i32
    %c0_i32_0 = arith.constant 0 : i32
    %c0_i32_1 = arith.constant 0 : i32
    return %c0_i32, %c0_i32_0 : i32, i32
  }
  func.func @transform_11(%arg0: i32) -> (i32, i32) {
    %c0_i32 = arith.constant 0 : i32
    %c0_i32_0 = arith.constant 0 : i32
    return %arg0, %c0_i32 : i32, i32
  }
}

</mosaic_0001>

<bundles_post_ra>
// kernel: fully_connected_net.1
= control target key start
LH: loop header
LB: loop body
LE: loop exit
PB: predicated region body
PF: predicated region fallthrough
CT: control target
= control target key end

     0   :  { %16 = vsyncpa [#allocation3], 0  ;;  %s4095_s0 = inlined_call_operand.vmem [shape: f32[8,896], index: 0, kind: input, shape index: {}]   ;;  %s4096_s1 = inlined_call_operand.hbm [shape: bf16[896,512], index: 1, kind: input, shape index: {}]   ;;  %s4097_s2 = inlined_call_operand.vmem [shape: f32[1,512], index: 2, kind: input, shape index: {}]   ;;  %s4098_s3 = inlined_call_operand.vmem [shape: bf16[512,256], index: 3, kind: input, shape index: {}]   ;;  %s4099_s4 = inlined_call_operand.vmem [shape: f32[1,256], index: 4, kind: input, shape index: {}]   ;;  %s4100_s5 = inlined_call_operand.vmem [shape: bf16[256,128], index: 5, kind: input, shape index: {}]   ;;  %s4101_s6 = inlined_call_operand.vmem [shape: f32[1,128], index: 6, kind: input, shape index: {}]   ;;  %s4102_s7 = inlined_call_operand.vmem [shape: bf16[128,128], index: 7, kind: input, shape index: {}]   ;;  %s4103_s8 = inlined_call_operand.vmem [shape: f32[1,128], index: 8, kind: input, shape index: {}]   ;;  %s4104_s9 = inlined_call_operand.vmem [shape: bf16[128,128], index: 9, kind: input, shape index: {}]   ;;  %s4105_s10 = inlined_call_operand.vmem [shape: f32[1,128], index: 10, kind: input, shape index: {}]   ;;  %s4106_s11 = inlined_call_operand.hbm [shape: f32[8,128], index: 11, kind: output, shape index: {}]  }
   0x1   :  { %17 = vsyncpa [#allocation4], 0  ;;  %s3639_s17 = smov [#allocation2]   ;;  %s3591_s21 = scalar_lea.hbm %s4096_s1, 28672 }
   0x2   :  { %s25_s18 = sshll.u32 %s3639_s17, 4  ;;  %p3592_p0 = scmp.ne.s32.totalorder %s4096_s1, %s3591_s21  ;;  %s26_s18 = int_to_ptr.vmem [resolvable:$true] %s25_s18 }
   0x3   :  { %p3595_p1 = scmp.lt.u32.totalorder %s3591_s21, %s4096_s1 }
   0x5   :  { %p3597_p2 = pnand %p3595_p1, %p3592_p0 }
   0x7   :  { %3600 = shalt.err (!%p3597_p2)
}
   0x8   :  { %s3601_s26 = scalar_lea.vmem %s26_s18, 28672  ;;  %p3606_p4 = scmp.lt.s32.totalorder %s26_s18, %s26_s18 }
   0x9   :  { %p3602_p3 = scmp.ne.s32.totalorder %s26_s18, %s3601_s26  ;;  %p3607_p5 = scmp.lt.s32.totalorder %s3601_s26, %s3601_s26 }
   0xb   :  { %p3608_p6 = por %p3607_p5, %p3606_p4 }
   0xd   :  { %p3609_p7 = pnand %p3608_p6, %p3602_p3 }
   0xf   :  { %3612 = shalt.err (!%p3609_p7)
}
  0x10   :  { %s3640_s27 = smov 256   ;;  %s3641_s28 = smov 16  }
  0x11   :  { %31 = dma.hbm_to_vmem [thread:$0]  %s4096_s1, 28672, %s26_s18, [#allocation3], %s3640_s27, %s3640_s27, %s3641_s28  }
  0x12   :  { %3635 = dma.done.wait [#allocation3], 28672  }
  0x13   :  { %3636 = vsyncadd [#allocation3], 4294938624  ;;  %v3123_v0 = vld [vmem:[#allocation2 + $0x4] ss:$16 sps:$4 sm:$0xff]   ;;  %v3125_v1 = vld [vmem:[#allocation2 + $0xc] ss:$16 sps:$4 sm:$0xff]  }
  0x14   :  { %1434 = vmatprep.subr.bf16.mxu0 %v3123_v0  ;;  %v3127_v2 = vld [vmem:[#allocation2] ss:$16 sps:$4 sm:$0xff]   ;;  %v3128_v3 = vld [vmem:[#allocation2 + $0x8] ss:$16 sps:$4 sm:$0xff]   ;;  %1598 = vmatprep.subr.bf16.mxu1 %v3125_v1  ;;  %v3129_v4 = vld [vmem:[#allocation2 + $0x24] ss:$16 sps:$4 sm:$0xff]  }
  0x15   :  { %1435 = vmatpush1.bf16.msra.mxu0 %v3127_v2  ;;  %1599 = vmatpush1.bf16.msra.mxu1 %v3128_v3  ;;  %v3131_v5 = vld [vmem:[#allocation2 + $0x2c] ss:$16 sps:$4 sm:$0xff]   ;;  %v3133_v6 = vld [vmem:[#allocation2 + $0x20] ss:$16 sps:$4 sm:$0xff]   ;;  %v3134_v7 = vld [vmem:[#allocation2 + $0x28] ss:$16 sps:$4 sm:$0xff]  }
  0x16   :  { %1436 = vmatprep.subr.bf16.mxu0 %v3129_v4  ;;  %1600 = vmatprep.subr.bf16.mxu1 %v3131_v5  ;;  %v3135_v8 = vld [vmem:[#allocation2 + $0x44] ss:$16 sps:$4 sm:$0xff]   ;;  %v3137_v9 = vld [vmem:[#allocation2 + $0x4c] ss:$16 sps:$4 sm:$0xff]   ;;  %v3139_v10 = vld [vmem:[#allocation2 + $0x40] ss:$16 sps:$4 sm:$0xff]  }
  0x17   :  { %v3140_v11 = vld [vmem:[#allocation2 + $0x48] ss:$16 sps:$4 sm:$0xff]   ;;  %v3141_v12 = vld [vmem:[#allocation2 + $0x64] ss:$16 sps:$4 sm:$0xff]   ;;  %v3143_v13 = vld [vmem:[#allocation2 + $0x6c] ss:$16 sps:$4 sm:$0xff]  }
  0x18   :  { %v3145_v14 = vld [vmem:[#allocation2 + $0x60] ss:$16 sps:$4 sm:$0xff]   ;;  %v3146_v15 = vld [vmem:[#allocation2 + $0x68] ss:$16 sps:$4 sm:$0xff]   ;;  %v3147_v16 = vld [vmem:[#allocation2 + $0x84] ss:$16 sps:$4 sm:$0xff]  }
  0x19   :  { %1437 = vmatpush1.bf16.msra.mxu0 %v3133_v6  ;;  %1601 = vmatpush1.bf16.msra.mxu1 %v3134_v7  ;;  %v3149_v17 = vld [vmem:[#allocation2 + $0x8c] ss:$16 sps:$4 sm:$0xff]   ;;  %v3151_v18 = vld [vmem:[#allocation2 + $0x80] ss:$16 sps:$4 sm:$0xff]   ;;  %v3152_v19 = vld [vmem:[#allocation2 + $0x88] ss:$16 sps:$4 sm:$0xff]  }
  0x1a   :  { %1438 = vmatprep.subr.bf16.mxu0 %v3135_v8  ;;  %1602 = vmatprep.subr.bf16.mxu1 %v3137_v9  ;;  %v3153_v20 = vld [vmem:[#allocation2 + $0xa4] ss:$16 sps:$4 sm:$0xff]   ;;  %v3155_v21 = vld [vmem:[#allocation2 + $0xac] ss:$16 sps:$4 sm:$0xff]   ;;  %v3157_v22 = vld [vmem:[#allocation2 + $0xa0] ss:$16 sps:$4 sm:$0xff]  }
  0x1b   :  { %v3158_v23 = vld [vmem:[#allocation2 + $0xa8] ss:$16 sps:$4 sm:$0xff]   ;;  %v3159_v24 = vld [vmem:[#allocation2 + $0xc4] ss:$16 sps:$4 sm:$0xff]   ;;  %v3161_v25 = vld [vmem:[#allocation2 + $0xcc] ss:$16 sps:$4 sm:$0xff]  }
  0x1c   :  { %v3163_v26 = vld [vmem:[#allocation2 + $0xc0] ss:$16 sps:$4 sm:$0xff]   ;;  %v3164_v27 = vld [vmem:[#allocation2 + $0xc8] ss:$16 sps:$4 sm:$0xff]   ;;  %v3165_v28 = vld [vmem:[#allocation2 + $0xe4] ss:$16 sps:$4 sm:$0xff]  }
  0x1d   :  { %1439 = vmatpush1.bf16.msra.mxu0 %v3139_v10  ;;  %1603 = vmatpush1.bf16.msra.mxu1 %v3140_v11  ;;  %v3167_v29 = vld [vmem:[#allocation2 + $0xec] ss:$16 sps:$4 sm:$0xff]   ;;  %v3169_v30 = vld [vmem:[#allocation2 + $0xe0] ss:$16 sps:$4 sm:$0xff]   ;;  %v3170_v31 = vld [vmem:[#allocation2 + $0xe8] ss:$16 sps:$4 sm:$0xff]  }
  0x1e   :  { %1440 = vmatprep.subr.bf16.mxu0 %v3141_v12  ;;  %1604 = vmatprep.subr.bf16.mxu1 %v3143_v13  ;;  %v3171_v32 = vld [vmem:[#allocation2 + $0x104] ss:$16 sps:$4 sm:$0xff]   ;;  %v3173_v33 = vld [vmem:[#allocation2 + $0x10c] ss:$16 sps:$4 sm:$0xff]   ;;  %v3175_v34 = vld [vmem:[#allocation2 + $0x100] ss:$16 sps:$4 sm:$0xff]  }
  0x1f   :  { %v3176_v35 = vld [vmem:[#allocation2 + $0x108] ss:$16 sps:$4 sm:$0xff]   ;;  %v3177_v36 = vld [vmem:[#allocation2 + $0x124] ss:$16 sps:$4 sm:$0xff]   ;;  %v3179_v37 = vld [vmem:[#allocation2 + $0x12c] ss:$16 sps:$4 sm:$0xff]  }
  0x20   :  { %v3181_v38 = vld [vmem:[#allocation2 + $0x120] ss:$16 sps:$4 sm:$0xff]   ;;  %v3182_v39 = vld [vmem:[#allocation2 + $0x128] ss:$16 sps:$4 sm:$0xff]   ;;  %v3183_v40 = vld [vmem:[#allocation2 + $0x144] ss:$16 sps:$4 sm:$0xff]  }
  0x21   :  { %1441 = vmatpush1.bf16.msra.mxu0 %v3145_v14  ;;  %1605 = vmatpush1.bf16.msra.mxu1 %v3146_v15  ;;  %v3185_v41 = vld [vmem:[#allocation2 + $0x14c] ss:$16 sps:$4 sm:$0xff]   ;;  %v3187_v42 = vld [vmem:[#allocation2 + $0x140] ss:$16 sps:$4 sm:$0xff]   ;;  %v3188_v43 = vld [vmem:[#allocation2 + $0x148] ss:$16 sps:$4 sm:$0xff]  }
  0x22   :  { %1442 = vmatprep.subr.bf16.mxu0 %v3147_v16  ;;  %1606 = vmatprep.subr.bf16.mxu1 %v3149_v17  ;;  %v3189_v44 = vld [vmem:[#allocation2 + $0x164] ss:$16 sps:$4 sm:$0xff]   ;;  %v3191_v45 = vld [vmem:[#allocation2 + $0x16c] ss:$16 sps:$4 sm:$0xff]   ;;  %v3193_v47 = vld [vmem:[#allocation2 + $0x160] ss:$16 sps:$4 sm:$0xff]  }
  0x23   :  { %v55_v46 = vld [vmem:[%s4095_s0 + $0x8] sm:$0xff]  ;;  %v3195_v50 = vld [vmem:[#allocation2 + $0x184] ss:$16 sps:$4 sm:$0xff]   ;;  %v3199_v52 = vld [vmem:[#allocation2 + $0x180] ss:$16 sps:$4 sm:$0xff]   ;;  %vm3644_vm0 = vmmov 0  }
  0x24   :  { %v62_v48 = vpack.c.bf16 %v55_v46, %v55_v46  ;;  %v3194_v49 = vld [vmem:[#allocation2 + $0x168] ss:$16 sps:$4 sm:$0xff]   ;;  %v3197_v51 = vld [vmem:[#allocation2 + $0x18c] ss:$16 sps:$4 sm:$0xff]   ;;  %v3201_v54 = vld [vmem:[#allocation2 + $0x1a4] ss:$16 sps:$4 sm:$0xff]  }
  0x25   :  { %1443 = vmatpush1.bf16.msra.mxu0 %v3151_v18  ;;  %1607 = vmatpush1.bf16.msra.mxu1 %v3152_v19  ;;  %v3200_v53 = vld [vmem:[#allocation2 + $0x188] ss:$16 sps:$4 sm:$0xff]   ;;  %v3203_v55 = vld [vmem:[#allocation2 + $0x1ac] ss:$16 sps:$4 sm:$0xff]   ;;  %v3205_v56 = vld [vmem:[#allocation2 + $0x1a0] ss:$16 sps:$4 sm:$0xff]  }
  0x26   :  { %1444 = vmatprep.subr.bf16.mxu0 %v3153_v20  ;;  %1608 = vmatprep.subr.bf16.mxu1 %v3155_v21  ;;  %v3206_v57 = vld [vmem:[#allocation2 + $0x1a8] ss:$16 sps:$4 sm:$0xff]   ;;  %v3207_v58 = vld [vmem:[#allocation2 + $0x1c4] ss:$16 sps:$4 sm:$0xff]   ;;  %v3209_v59 = vld [vmem:[#allocation2 + $0x1cc] ss:$16 sps:$4 sm:$0xff]  }
  0x27   :  { %1466 = vmatprep.mubr.bf16.mxu0 %v62_v48  ;;  %1630 = vmatprep.mubr.bf16.mxu1 %v62_v48  ;;  %v3211_v60 = vld [vmem:[#allocation2 + $0x1c0] ss:$16 sps:$4 sm:$0xff]   ;;  %v3212_v61 = vld [vmem:[#allocation2 + $0x1c8] ss:$16 sps:$4 sm:$0xff]   ;;  %v3213_v62 = vld [vmem:[#allocation2 + $0x1e4] ss:$16 sps:$4 sm:$0xff]  }
  0x28   :  { %v3215_v63 = vld [vmem:[#allocation2 + $0x1ec] ss:$16 sps:$4 sm:$0xff]   ;;  %v3217_v0 = vld [vmem:[#allocation2 + $0x1e0] ss:$16 sps:$4 sm:$0xff]   ;;  %v3218_v1 = vld [vmem:[#allocation2 + $0x1e8] ss:$16 sps:$4 sm:$0xff]  }
  0x29   :  { %1445 = vmatpush1.bf16.msra.mxu0 %v3157_v22  ;;  %1609 = vmatpush1.bf16.msra.mxu1 %v3158_v23  ;;  %v54_v2 = vld [vmem:[%s4095_s0] sm:$0xff]  ;;  %v3224_v4 = vld [vmem:[#allocation2 + $0x20c] ss:$16 sps:$4 sm:$0xff]   ;;  %v3222_v7 = vld [vmem:[#allocation2 + $0x208] ss:$16 sps:$4 sm:$0xff]  }
  0x2a   :  { %1446 = vmatprep.subr.bf16.mxu0 %v3159_v24  ;;  %1610 = vmatprep.subr.bf16.mxu1 %v3161_v25  ;;  %v3221_v3 = vld [vmem:[#allocation2 + $0x204] ss:$16 sps:$4 sm:$0xff]   ;;  %v61_v5 = vpack.c.bf16 %v54_v2, %v54_v2  ;;  %v3219_v6 = vld [vmem:[#allocation2 + $0x200] ss:$16 sps:$4 sm:$0xff]   ;;  %v3230_v9 = vld [vmem:[#allocation2 + $0x22c] ss:$16 sps:$4 sm:$0xff]  }
  0x2b   :  { %v3227_v8 = vld [vmem:[#allocation2 + $0x224] ss:$16 sps:$4 sm:$0xff]   ;;  %v3225_v10 = vld [vmem:[#allocation2 + $0x220] ss:$16 sps:$4 sm:$0xff]   ;;  %v3228_v11 = vld [vmem:[#allocation2 + $0x228] ss:$16 sps:$4 sm:$0xff]  }
  0x2c   :  { %v3233_v12 = vld [vmem:[#allocation2 + $0x244] ss:$16 sps:$4 sm:$0xff]   ;;  %v3236_v13 = vld [vmem:[#allocation2 + $0x24c] ss:$16 sps:$4 sm:$0xff]   ;;  %v3231_v14 = vld [vmem:[#allocation2 + $0x240] ss:$16 sps:$4 sm:$0xff]  }
  0x2d   :  { %1447 = vmatpush1.bf16.msra.mxu0 %v3163_v26  ;;  %1611 = vmatpush1.bf16.msra.mxu1 %v3164_v27  ;;  %v3234_v15 = vld [vmem:[#allocation2 + $0x248] ss:$16 sps:$4 sm:$0xff]   ;;  %v3239_v16 = vld [vmem:[#allocation2 + $0x264] ss:$16 sps:$4 sm:$0xff]   ;;  %v3242_v17 = vld [vmem:[#allocation2 + $0x26c] ss:$16 sps:$4 sm:$0xff]  }
  0x2e   :  { %1448 = vmatprep.subr.bf16.mxu0 %v3165_v28  ;;  %1612 = vmatprep.subr.bf16.mxu1 %v3167_v29  ;;  %v3237_v18 = vld [vmem:[#allocation2 + $0x260] ss:$16 sps:$4 sm:$0xff]   ;;  %v3240_v19 = vld [vmem:[#allocation2 + $0x268] ss:$16 sps:$4 sm:$0xff]   ;;  %v3245_v20 = vld [vmem:[#allocation2 + $0x284] ss:$16 sps:$4 sm:$0xff]  }
  0x2f   :  { %v3248_v21 = vld [vmem:[#allocation2 + $0x28c] ss:$16 sps:$4 sm:$0xff]   ;;  %v3243_v22 = vld [vmem:[#allocation2 + $0x280] ss:$16 sps:$4 sm:$0xff]   ;;  %v3246_v23 = vld [vmem:[#allocation2 + $0x288] ss:$16 sps:$4 sm:$0xff]  }
  0x30   :  { %v3251_v24 = vld [vmem:[#allocation2 + $0x2a4] ss:$16 sps:$4 sm:$0xff]   ;;  %v3254_v25 = vld [vmem:[#allocation2 + $0x2ac] ss:$16 sps:$4 sm:$0xff]   ;;  %v3249_v26 = vld [vmem:[#allocation2 + $0x2a0] ss:$16 sps:$4 sm:$0xff]  }
  0x31   :  { %1449 = vmatpush1.bf16.msra.mxu0 %v3169_v30  ;;  %1613 = vmatpush1.bf16.msra.mxu1 %v3170_v31  ;;  %v3252_v27 = vld [vmem:[#allocation2 + $0x2a8] ss:$16 sps:$4 sm:$0xff]   ;;  %v3257_v28 = vld [vmem:[#allocation2 + $0x2c4] ss:$16 sps:$4 sm:$0xff]   ;;  %v3260_v29 = vld [vmem:[#allocation2 + $0x2cc] ss:$16 sps:$4 sm:$0xff]  }
  0x32   :  { %1450 = vmatprep.subr.bf16.mxu0 %v3171_v32  ;;  %1614 = vmatprep.subr.bf16.mxu1 %v3173_v33  ;;  %v57_v30 = vld [vmem:[%s4095_s0 + $0x18] sm:$0xff]  ;;  %v3255_v31 = vld [vmem:[#allocation2 + $0x2c0] ss:$16 sps:$4 sm:$0xff]   ;;  %v3281_v46 = vld [vmem:[#allocation2 + $0x344] ss:$16 sps:$4 sm:$0xff]  }
  0x33   :  { %v64_v32 = vpack.c.bf16 %v57_v30, %v57_v30  ;;  %v3258_v33 = vld [vmem:[#allocation2 + $0x2c8] ss:$16 sps:$4 sm:$0xff]   ;;  %v3279_v48 = vld [vmem:[#allocation2 + $0x340] ss:$16 sps:$4 sm:$0xff]   ;;  %v3311_v2 = vld [vmem:[#allocation2 + $0x3e4] ss:$16 sps:$4 sm:$0xff]  }
  0x34   :  { %v3347_v30 = vld [vmem:[#allocation2 + $0x4a4] ss:$16 sps:$4 sm:$0xff]  }
  0x35   :  { %1451 = vmatpush1.bf16.msra.mxu0 %v3175_v34  ;;  %1615 = vmatpush1.bf16.msra.mxu1 %v3176_v35  ;;  %v3263_v34 = vld [vmem:[#allocation2 + $0x2e4] ss:$16 sps:$4 sm:$0xff]   ;;  %v3266_v35 = vld [vmem:[#allocation2 + $0x2ec] ss:$16 sps:$4 sm:$0xff]  }
  0x36   :  { %1452 = vmatprep.subr.bf16.mxu0 %v3177_v36  ;;  %1616 = vmatprep.subr.bf16.mxu1 %v3179_v37  ;;  %v3261_v36 = vld [vmem:[#allocation2 + $0x2e0] ss:$16 sps:$4 sm:$0xff]   ;;  %v3264_v37 = vld [vmem:[#allocation2 + $0x2e8] ss:$16 sps:$4 sm:$0xff]  }
  0x39   :  { %1453 = vmatpush1.bf16.msra.mxu0 %v3181_v38  ;;  %1617 = vmatpush1.bf16.msra.mxu1 %v3182_v39  ;;  %v3269_v38 = vld [vmem:[#allocation2 + $0x304] ss:$16 sps:$4 sm:$0xff]   ;;  %v3272_v39 = vld [vmem:[#allocation2 + $0x30c] ss:$16 sps:$4 sm:$0xff]  }
  0x3a   :  { %1454 = vmatprep.subr.bf16.mxu0 %v3183_v40  ;;  %1618 = vmatprep.subr.bf16.mxu1 %v3185_v41  ;;  %v3267_v40 = vld [vmem:[#allocation2 + $0x300] ss:$16 sps:$4 sm:$0xff]   ;;  %v3270_v41 = vld [vmem:[#allocation2 + $0x308] ss:$16 sps:$4 sm:$0xff]  }
  0x3d   :  { %1455 = vmatpush1.bf16.msra.mxu0 %v3187_v42  ;;  %1619 = vmatpush1.bf16.msra.mxu1 %v3188_v43  ;;  %v3275_v42 = vld [vmem:[#allocation2 + $0x324] ss:$16 sps:$4 sm:$0xff]   ;;  %v3278_v43 = vld [vmem:[#allocation2 + $0x32c] ss:$16 sps:$4 sm:$0xff]  }
  0x3e   :  { %1456 = vmatprep.subr.bf16.mxu0 %v3189_v44  ;;  %1620 = vmatprep.subr.bf16.mxu1 %v3191_v45  ;;  %v3273_v44 = vld [vmem:[#allocation2 + $0x320] ss:$16 sps:$4 sm:$0xff]   ;;  %v3276_v45 = vld [vmem:[#allocation2 + $0x328] ss:$16 sps:$4 sm:$0xff]  }
  0x41   :  { %1457 = vmatpush1.bf16.msra.mxu0 %v3193_v47  ;;  %1621 = vmatpush1.bf16.msra.mxu1 %v3194_v49  ;;  %v3284_v47 = vld [vmem:[#allocation2 + $0x34c] ss:$16 sps:$4 sm:$0xff]   ;;  %v3282_v49 = vld [vmem:[#allocation2 + $0x348] ss:$16 sps:$4 sm:$0xff]  }
  0x42   :  { %1458 = vmatprep.subr.bf16.mxu0 %v3195_v50  ;;  %1622 = vmatprep.subr.bf16.mxu1 %v3197_v51  ;;  %v3287_v50 = vld [vmem:[#allocation2 + $0x364] ss:$16 sps:$4 sm:$0xff]   ;;  %v3290_v51 = vld [vmem:[#allocation2 + $0x36c] ss:$16 sps:$4 sm:$0xff]  }
  0x45   :  { %1459 = vmatpush1.bf16.msra.mxu0 %v3199_v52  ;;  %1623 = vmatpush1.bf16.msra.mxu1 %v3200_v53  ;;  %v3285_v52 = vld [vmem:[#allocation2 + $0x360] ss:$16 sps:$4 sm:$0xff]   ;;  %v3288_v53 = vld [vmem:[#allocation2 + $0x368] ss:$16 sps:$4 sm:$0xff]  }
  0x46   :  { %1460 = vmatprep.subr.bf16.mxu0 %v3201_v54  ;;  %1624 = vmatprep.subr.bf16.mxu1 %v3203_v55  ;;  %v3293_v54 = vld [vmem:[#allocation2 + $0x384] ss:$16 sps:$4 sm:$0xff]   ;;  %v3296_v55 = vld [vmem:[#allocation2 + $0x38c] ss:$16 sps:$4 sm:$0xff]  }
  0x49   :  { %1461 = vmatpush1.bf16.msra.mxu0 %v3205_v56  ;;  %1625 = vmatpush1.bf16.msra.mxu1 %v3206_v57  ;;  %v3291_v56 = vld [vmem:[#allocation2 + $0x380] ss:$16 sps:$4 sm:$0xff]   ;;  %v3294_v57 = vld [vmem:[#allocation2 + $0x388] ss:$16 sps:$4 sm:$0xff]  }
  0x4a   :  { %1462 = vmatprep.subr.bf16.mxu0 %v3207_v58  ;;  %1626 = vmatprep.subr.bf16.mxu1 %v3209_v59  ;;  %v3299_v58 = vld [vmem:[#allocation2 + $0x3a4] ss:$16 sps:$4 sm:$0xff]   ;;  %v3302_v59 = vld [vmem:[#allocation2 + $0x3ac] ss:$16 sps:$4 sm:$0xff]  }
  0x4d   :  { %1463 = vmatpush1.bf16.msra.mxu0 %v3211_v60  ;;  %1627 = vmatpush1.bf16.msra.mxu1 %v3212_v61  ;;  %v3297_v60 = vld [vmem:[#allocation2 + $0x3a0] ss:$16 sps:$4 sm:$0xff]   ;;  %v3300_v61 = vld [vmem:[#allocation2 + $0x3a8] ss:$16 sps:$4 sm:$0xff]  }
  0x4e   :  { %1464 = vmatprep.subr.bf16.mxu0 %v3213_v62  ;;  %1628 = vmatprep.subr.bf16.mxu1 %v3215_v63  ;;  %v3305_v62 = vld [vmem:[#allocation2 + $0x3c4] ss:$16 sps:$4 sm:$0xff]   ;;  %v3308_v63 = vld [vmem:[#allocation2 + $0x3cc] ss:$16 sps:$4 sm:$0xff]  }
  0x51   :  { %1465 = vmatpush1.bf16.msra.mxu0 %v3217_v0  ;;  %1629 = vmatpush1.bf16.msra.mxu1 %v3218_v1  ;;  %v3303_v0 = vld [vmem:[#allocation2 + $0x3c0] ss:$16 sps:$4 sm:$0xff]   ;;  %v3306_v1 = vld [vmem:[#allocation2 + $0x3c8] ss:$16 sps:$4 sm:$0xff]  }
  0x52   :  { %1475 = vmatprep.subr.bf16.mxu0 %v3221_v3  ;;  %1639 = vmatprep.subr.bf16.mxu1 %v3224_v4  ;;  %v3314_v3 = vld [vmem:[#allocation2 + $0x3ec] ss:$16 sps:$4 sm:$0xff]   ;;  %v3309_v4 = vld [vmem:[#allocation2 + $0x3e0] ss:$16 sps:$4 sm:$0xff]  }
  0x54   :  { %1467 = vmatmul.mubr.bf16.vlgmr.msra.gmra.mrb[0].mxu0 %v61_v5  ;;  %1631 = vmatmul.mubr.bf16.vlgmr.msra.gmra.mrb[0].mxu1 %v61_v5  ;;  %v3312_v5 = vld [vmem:[#allocation2 + $0x3e8] ss:$16 sps:$4 sm:$0xff]  }
  0x55   :  { %1476 = vmatpush1.bf16.msra.mxu0 %v3219_v6  ;;  %1640 = vmatpush1.bf16.msra.mxu1 %v3222_v7  ;;  %v3317_v6 = vld [vmem:[#allocation2 + $0x404] ss:$16 sps:$4 sm:$0xff]  }
  0x56   :  { %1477 = vmatprep.subr.bf16.mxu0 %v3227_v8  ;;  %1641 = vmatprep.subr.bf16.mxu1 %v3230_v9  ;;  %v56_v7 = vld [vmem:[%s4095_s0 + $0x10] sm:$0xff]  ;;  %v3320_v8 = vld [vmem:[#allocation2 + $0x40c] ss:$16 sps:$4 sm:$0xff]  }
  0x57   :  { %1507 = vmatprep.mubr.bf16.mxu0 %v64_v32  ;;  %1671 = vmatprep.mubr.bf16.mxu1 %v64_v32  ;;  %v3315_v9 = vld [vmem:[#allocation2 + $0x400] ss:$16 sps:$4 sm:$0xff]  }
  0x58   :  { %v3345_v32 = vld [vmem:[#allocation2 + $0x4a0] ss:$16 sps:$4 sm:$0xff]  }
  0x59   :  { %1478 = vmatpush1.bf16.msra.mxu0 %v3225_v10  ;;  %1642 = vmatpush1.bf16.msra.mxu1 %v3228_v11  ;;  %v3318_v10 = vld [vmem:[#allocation2 + $0x408] ss:$16 sps:$4 sm:$0xff]   ;;  %v63_v11 = vpack.c.bf16 %v56_v7, %v56_v7  ;;  %v3410_v7 = vld [vmem:[#allocation2 + $0x5ec] ss:$16 sps:$4 sm:$0xff]  }
  0x5a   :  { %1479 = vmatprep.subr.bf16.mxu0 %v3233_v12  ;;  %1643 = vmatprep.subr.bf16.mxu1 %v3236_v13  ;;  %v3323_v12 = vld [vmem:[#allocation2 + $0x424] ss:$16 sps:$4 sm:$0xff]   ;;  %v3326_v13 = vld [vmem:[#allocation2 + $0x42c] ss:$16 sps:$4 sm:$0xff]  }
  0x5d   :  { %1480 = vmatpush1.bf16.msra.mxu0 %v3231_v14  ;;  %1644 = vmatpush1.bf16.msra.mxu1 %v3234_v15  ;;  %v59_v14 = vld [vmem:[%s4095_s0 + $0x28] sm:$0xff] }
  0x5e   :  { %1481 = vmatprep.subr.bf16.mxu0 %v3239_v16  ;;  %1645 = vmatprep.subr.bf16.mxu1 %v3242_v17  ;;  %v66_v15 = vpack.c.bf16 %v59_v14, %v59_v14  ;;  %v3321_v16 = vld [vmem:[#allocation2 + $0x420] ss:$16 sps:$4 sm:$0xff]   ;;  %v3324_v17 = vld [vmem:[#allocation2 + $0x428] ss:$16 sps:$4 sm:$0xff]  }
  0x5f   :  { %v3414_v14 = vld [vmem:[#allocation2 + $0x608] ss:$16 sps:$4 sm:$0xff]  }
  0x61   :  { %1482 = vmatpush1.bf16.msra.mxu0 %v3237_v18  ;;  %1646 = vmatpush1.bf16.msra.mxu1 %v3240_v19  ;;  %v3329_v18 = vld [vmem:[#allocation2 + $0x444] ss:$16 sps:$4 sm:$0xff]   ;;  %v3332_v19 = vld [vmem:[#allocation2 + $0x44c] ss:$16 sps:$4 sm:$0xff]  }
  0x62   :  { %1483 = vmatprep.subr.bf16.mxu0 %v3245_v20  ;;  %1647 = vmatprep.subr.bf16.mxu1 %v3248_v21  ;;  %v3327_v20 = vld [vmem:[#allocation2 + $0x440] ss:$16 sps:$4 sm:$0xff]   ;;  %v3330_v21 = vld [vmem:[#allocation2 + $0x448] ss:$16 sps:$4 sm:$0xff]  }
  0x65   :  { %1484 = vmatpush1.bf16.msra.mxu0 %v3243_v22  ;;  %1648 = vmatpush1.bf16.msra.mxu1 %v3246_v23  ;;  %v3335_v22 = vld [vmem:[#allocation2 + $0x464] ss:$16 sps:$4 sm:$0xff]   ;;  %v3338_v23 = vld [vmem:[#allocation2 + $0x46c] ss:$16 sps:$4 sm:$0xff]  }
  0x66   :  { %1485 = vmatprep.subr.bf16.mxu0 %v3251_v24  ;;  %1649 = vmatprep.subr.bf16.mxu1 %v3254_v25  ;;  %v3333_v24 = vld [vmem:[#allocation2 + $0x460] ss:$16 sps:$4 sm:$0xff]   ;;  %v3336_v25 = vld [vmem:[#allocation2 + $0x468] ss:$16 sps:$4 sm:$0xff]  }
  0x69   :  { %1486 = vmatpush1.bf16.msra.mxu0 %v3249_v26  ;;  %1650 = vmatpush1.bf16.msra.mxu1 %v3252_v27  ;;  %v3341_v26 = vld [vmem:[#allocation2 + $0x484] ss:$16 sps:$4 sm:$0xff]   ;;  %v3344_v27 = vld [vmem:[#allocation2 + $0x48c] ss:$16 sps:$4 sm:$0xff]  }
  0x6a   :  { %1487 = vmatprep.subr.bf16.mxu0 %v3257_v28  ;;  %1651 = vmatprep.subr.bf16.mxu1 %v3260_v29  ;;  %v3339_v28 = vld [vmem:[#allocation2 + $0x480] ss:$16 sps:$4 sm:$0xff]   ;;  %v3342_v29 = vld [vmem:[#allocation2 + $0x488] ss:$16 sps:$4 sm:$0xff]  }
  0x6d   :  { %1488 = vmatpush1.bf16.msra.mxu0 %v3255_v31  ;;  %1652 = vmatpush1.bf16.msra.mxu1 %v3258_v33  ;;  %v3350_v31 = vld [vmem:[#allocation2 + $0x4ac] ss:$16 sps:$4 sm:$0xff]   ;;  %v3348_v33 = vld [vmem:[#allocation2 + $0x4a8] ss:$16 sps:$4 sm:$0xff]  }
  0x6e   :  { %1489 = vmatprep.subr.bf16.mxu0 %v3263_v34  ;;  %1653 = vmatprep.subr.bf16.mxu1 %v3266_v35  ;;  %v3353_v34 = vld [vmem:[#allocation2 + $0x4c4] ss:$16 sps:$4 sm:$0xff]   ;;  %v3356_v35 = vld [vmem:[#allocation2 + $0x4cc] ss:$16 sps:$4 sm:$0xff]  }
  0x71   :  { %1490 = vmatpush1.bf16.msra.mxu0 %v3261_v36  ;;  %1654 = vmatpush1.bf16.msra.mxu1 %v3264_v37  ;;  %v3351_v36 = vld [vmem:[#allocation2 + $0x4c0] ss:$16 sps:$4 sm:$0xff]   ;;  %v3354_v37 = vld [vmem:[#allocation2 + $0x4c8] ss:$16 sps:$4 sm:$0xff]  }
  0x72   :  { %1491 = vmatprep.subr.bf16.mxu0 %v3269_v38  ;;  %1655 = vmatprep.subr.bf16.mxu1 %v3272_v39  ;;  %v3359_v38 = vld [vmem:[#allocation2 + $0x4e4] ss:$16 sps:$4 sm:$0xff]   ;;  %v3362_v39 = vld [vmem:[#allocation2 + $0x4ec] ss:$16 sps:$4 sm:$0xff]  }
  0x75   :  { %1492 = vmatpush1.bf16.msra.mxu0 %v3267_v40  ;;  %1656 = vmatpush1.bf16.msra.mxu1 %v3270_v41  ;;  %v3357_v40 = vld [vmem:[#allocation2 + $0x4e0] ss:$16 sps:$4 sm:$0xff]   ;;  %v3360_v41 = vld [vmem:[#allocation2 + $0x4e8] ss:$16 sps:$4 sm:$0xff]  }
  0x76   :  { %1493 = vmatprep.subr.bf16.mxu0 %v3275_v42  ;;  %1657 = vmatprep.subr.bf16.mxu1 %v3278_v43  ;;  %v3365_v42 = vld [vmem:[#allocation2 + $0x504] ss:$16 sps:$4 sm:$0xff]   ;;  %v3368_v43 = vld [vmem:[#allocation2 + $0x50c] ss:$16 sps:$4 sm:$0xff]  }
  0x79   :  { %1494 = vmatpush1.bf16.msra.mxu0 %v3273_v44  ;;  %1658 = vmatpush1.bf16.msra.mxu1 %v3276_v45  ;;  %v3363_v44 = vld [vmem:[#allocation2 + $0x500] ss:$16 sps:$4 sm:$0xff]   ;;  %v3366_v45 = vld [vmem:[#allocation2 + $0x508] ss:$16 sps:$4 sm:$0xff]  }
  0x7a   :  { %1495 = vmatprep.subr.bf16.mxu0 %v3281_v46  ;;  %1659 = vmatprep.subr.bf16.mxu1 %v3284_v47  ;;  %v3371_v46 = vld [vmem:[#allocation2 + $0x524] ss:$16 sps:$4 sm:$0xff]   ;;  %v3374_v47 = vld [vmem:[#allocation2 + $0x52c] ss:$16 sps:$4 sm:$0xff]  }
  0x7d   :  { %1496 = vmatpush1.bf16.msra.mxu0 %v3279_v48  ;;  %1660 = vmatpush1.bf16.msra.mxu1 %v3282_v49  ;;  %v3369_v48 = vld [vmem:[#allocation2 + $0x520] ss:$16 sps:$4 sm:$0xff]   ;;  %v3372_v49 = vld [vmem:[#allocation2 + $0x528] ss:$16 sps:$4 sm:$0xff]  }
  0x7e   :  { %1497 = vmatprep.subr.bf16.mxu0 %v3287_v50  ;;  %1661 = vmatprep.subr.bf16.mxu1 %v3290_v51  ;;  %v3377_v50 = vld [vmem:[#allocation2 + $0x544] ss:$16 sps:$4 sm:$0xff]   ;;  %v3380_v51 = vld [vmem:[#allocation2 + $0x54c] ss:$16 sps:$4 sm:$0xff]  }
  0x81   :  { %1498 = vmatpush1.bf16.msra.mxu0 %v3285_v52  ;;  %1662 = vmatpush1.bf16.msra.mxu1 %v3288_v53  ;;  %v3375_v52 = vld [vmem:[#allocation2 + $0x540] ss:$16 sps:$4 sm:$0xff]   ;;  %v3378_v53 = vld [vmem:[#allocation2 + $0x548] ss:$16 sps:$4 sm:$0xff]  }
  0x82   :  { %1499 = vmatprep.subr.bf16.mxu0 %v3293_v54  ;;  %1663 = vmatprep.subr.bf16.mxu1 %v3296_v55  ;;  %v3383_v54 = vld [vmem:[#allocation2 + $0x564] ss:$16 sps:$4 sm:$0xff]   ;;  %v3386_v55 = vld [vmem:[#allocation2 + $0x56c] ss:$16 sps:$4 sm:$0xff]  }
  0x85   :  { %1500 = vmatpush1.bf16.msra.mxu0 %v3291_v56  ;;  %1664 = vmatpush1.bf16.msra.mxu1 %v3294_v57  ;;  %v3381_v56 = vld [vmem:[#allocation2 + $0x560] ss:$16 sps:$4 sm:$0xff]   ;;  %v3384_v57 = vld [vmem:[#allocation2 + $0x568] ss:$16 sps:$4 sm:$0xff]  }
  0x86   :  { %1501 = vmatprep.subr.bf16.mxu0 %v3299_v58  ;;  %1665 = vmatprep.subr.bf16.mxu1 %v3302_v59  ;;  %v3389_v58 = vld [vmem:[#allocation2 + $0x584] ss:$16 sps:$4 sm:$0xff]   ;;  %v3392_v59 = vld [vmem:[#allocation2 + $0x58c] ss:$16 sps:$4 sm:$0xff]  }
  0x89   :  { %1502 = vmatpush1.bf16.msra.mxu0 %v3297_v60  ;;  %1666 = vmatpush1.bf16.msra.mxu1 %v3300_v61  ;;  %v3387_v60 = vld [vmem:[#allocation2 + $0x580] ss:$16 sps:$4 sm:$0xff]   ;;  %v3390_v61 = vld [vmem:[#allocation2 + $0x588] ss:$16 sps:$4 sm:$0xff]  }
  0x8a   :  { %1503 = vmatprep.subr.bf16.mxu0 %v3305_v62  ;;  %1667 = vmatprep.subr.bf16.mxu1 %v3308_v63  ;;  %v3395_v62 = vld [vmem:[#allocation2 + $0x5a4] ss:$16 sps:$4 sm:$0xff]   ;;  %v3398_v63 = vld [vmem:[#allocation2 + $0x5ac] ss:$16 sps:$4 sm:$0xff]  }
  0x8d   :  { %1504 = vmatpush1.bf16.msra.mxu0 %v3303_v0  ;;  %1668 = vmatpush1.bf16.msra.mxu1 %v3306_v1  ;;  %v3393_v0 = vld [vmem:[#allocation2 + $0x5a0] ss:$16 sps:$4 sm:$0xff]   ;;  %v3396_v1 = vld [vmem:[#allocation2 + $0x5a8] ss:$16 sps:$4 sm:$0xff]  }
  0x8e   :  { %1505 = vmatprep.subr.bf16.mxu0 %v3311_v2  ;;  %1669 = vmatprep.subr.bf16.mxu1 %v3314_v3  ;;  %v3401_v2 = vld [vmem:[#allocation2 + $0x5c4] ss:$16 sps:$4 sm:$0xff]   ;;  %v3404_v3 = vld [vmem:[#allocation2 + $0x5cc] ss:$16 sps:$4 sm:$0xff]  }
  0x91   :  { %1506 = vmatpush1.bf16.msra.mxu0 %v3309_v4  ;;  %1670 = vmatpush1.bf16.msra.mxu1 %v3312_v5  ;;  %v3399_v4 = vld [vmem:[#allocation2 + $0x5c0] ss:$16 sps:$4 sm:$0xff]   ;;  %v3402_v5 = vld [vmem:[#allocation2 + $0x5c8] ss:$16 sps:$4 sm:$0xff]  }
  0x92   :  { %1516 = vmatprep.subr.bf16.mxu0 %v3317_v6  ;;  %1680 = vmatprep.subr.bf16.mxu1 %v3320_v8  ;;  %v3407_v6 = vld [vmem:[#allocation2 + $0x5e4] ss:$16 sps:$4 sm:$0xff]   ;;  %v3405_v8 = vld [vmem:[#allocation2 + $0x5e0] ss:$16 sps:$4 sm:$0xff]  }
  0x94   :  { %1508 = vmatmul.mubr.bf16.vlgmr.msra.gmra.mrb[0].mxu0 %v63_v11  ;;  %1672 = vmatmul.mubr.bf16.vlgmr.msra.gmra.mrb[0].mxu1 %v63_v11  ;;  %v3413_v11 = vld [vmem:[#allocation2 + $0x604] ss:$16 sps:$4 sm:$0xff]  }
  0x95   :  { %1517 = vmatpush1.bf16.msra.mxu0 %v3315_v9  ;;  %1681 = vmatpush1.bf16.msra.mxu1 %v3318_v10  ;;  %v3408_v9 = vld [vmem:[#allocation2 + $0x5e8] ss:$16 sps:$4 sm:$0xff]   ;;  %v58_v10 = vld [vmem:[%s4095_s0 + $0x20] sm:$0xff] }
  0x96   :  { %1518 = vmatprep.subr.bf16.mxu0 %v3323_v12  ;;  %1682 = vmatprep.subr.bf16.mxu1 %v3326_v13  ;;  %v3416_v12 = vld [vmem:[#allocation2 + $0x60c] ss:$16 sps:$4 sm:$0xff]   ;;  %v3411_v13 = vld [vmem:[#allocation2 + $0x600] ss:$16 sps:$4 sm:$0xff]  }
  0x97   :  { %1548 = vmatprep.mubr.bf16.mxu0 %v66_v15  ;;  %1712 = vmatprep.mubr.bf16.mxu1 %v66_v15  ;;  %v65_v15 = vpack.c.bf16 %v58_v10, %v58_v10  ;;  %v3498_v10 = vld [vmem:[%s4098_s3 + $0xd0] ss:$8 sps:$4 sm:$0xff]  }
  0x99   :  { %1519 = vmatpush1.bf16.msra.mxu0 %v3321_v16  ;;  %1683 = vmatpush1.bf16.msra.mxu1 %v3324_v17  ;;  %v3419_v16 = vld [vmem:[#allocation2 + $0x624] ss:$16 sps:$4 sm:$0xff]   ;;  %v3422_v17 = vld [vmem:[#allocation2 + $0x62c] ss:$16 sps:$4 sm:$0xff]  }
  0x9a   :  { %1520 = vmatprep.subr.bf16.mxu0 %v3329_v18  ;;  %1684 = vmatprep.subr.bf16.mxu1 %v3332_v19  ;;  %v3417_v18 = vld [vmem:[#allocation2 + $0x620] ss:$16 sps:$4 sm:$0xff]   ;;  %v3420_v19 = vld [vmem:[#allocation2 + $0x628] ss:$16 sps:$4 sm:$0xff]  }
  0x9d   :  { %1521 = vmatpush1.bf16.msra.mxu0 %v3327_v20  ;;  %1685 = vmatpush1.bf16.msra.mxu1 %v3330_v21  ;;  %v3425_v20 = vld [vmem:[#allocation2 + $0x644] ss:$16 sps:$4 sm:$0xff]   ;;  %v3428_v21 = vld [vmem:[#allocation2 + $0x64c] ss:$16 sps:$4 sm:$0xff]  }
  0x9e   :  { %1522 = vmatprep.subr.bf16.mxu0 %v3335_v22  ;;  %1686 = vmatprep.subr.bf16.mxu1 %v3338_v23  ;;  %v3423_v22 = vld [vmem:[#allocation2 + $0x640] ss:$16 sps:$4 sm:$0xff]   ;;  %v3426_v23 = vld [vmem:[#allocation2 + $0x648] ss:$16 sps:$4 sm:$0xff]  }
  0xa1   :  { %1523 = vmatpush1.bf16.msra.mxu0 %v3333_v24  ;;  %1687 = vmatpush1.bf16.msra.mxu1 %v3336_v25  ;;  %v3642_v24 = vmov 0   ;;  %v3431_v25 = vld [vmem:[#allocation2 + $0x664] ss:$16 sps:$4 sm:$0xff]  }
  0xa2   :  { %1524 = vmatprep.subr.bf16.mxu0 %v3341_v26  ;;  %1688 = vmatprep.subr.bf16.mxu1 %v3344_v27  ;;  %v3434_v26 = vld [vmem:[#allocation2 + $0x66c] ss:$16 sps:$4 sm:$0xff]   ;;  %v3429_v27 = vld [vmem:[#allocation2 + $0x660] ss:$16 sps:$4 sm:$0xff]  }
  0xa5   :  { %1525 = vmatpush1.bf16.msra.mxu0 %v3339_v28  ;;  %1689 = vmatpush1.bf16.msra.mxu1 %v3342_v29  ;;  %v3432_v28 = vld [vmem:[#allocation2 + $0x668] ss:$16 sps:$4 sm:$0xff]   ;;  %v3437_v29 = vld [vmem:[#allocation2 + $0x684] ss:$16 sps:$4 sm:$0xff]  }
  0xa6   :  { %1526 = vmatprep.subr.bf16.mxu0 %v3347_v30  ;;  %1690 = vmatprep.subr.bf16.mxu1 %v3350_v31  ;;  %v3440_v30 = vld [vmem:[#allocation2 + $0x68c] ss:$16 sps:$4 sm:$0xff]   ;;  %v3435_v31 = vld [vmem:[#allocation2 + $0x680] ss:$16 sps:$4 sm:$0xff]  }
  0xa9   :  { %1527 = vmatpush1.bf16.msra.mxu0 %v3345_v32  ;;  %1691 = vmatpush1.bf16.msra.mxu1 %v3348_v33  ;;  %v3438_v32 = vld [vmem:[#allocation2 + $0x688] ss:$16 sps:$4 sm:$0xff]   ;;  %v3443_v33 = vld [vmem:[#allocation2 + $0x6a4] ss:$16 sps:$4 sm:$0xff]  }
  0xaa   :  { %1528 = vmatprep.subr.bf16.mxu0 %v3353_v34  ;;  %1692 = vmatprep.subr.bf16.mxu1 %v3356_v35  ;;  %v3446_v34 = vld [vmem:[#allocation2 + $0x6ac] ss:$16 sps:$4 sm:$0xff]   ;;  %v3441_v35 = vld [vmem:[#allocation2 + $0x6a0] ss:$16 sps:$4 sm:$0xff]  }
  0xad   :  { %1529 = vmatpush1.bf16.msra.mxu0 %v3351_v36  ;;  %1693 = vmatpush1.bf16.msra.mxu1 %v3354_v37  ;;  %v3444_v36 = vld [vmem:[#allocation2 + $0x6a8] ss:$16 sps:$4 sm:$0xff]   ;;  %v3449_v37 = vld [vmem:[#allocation2 + $0x6c4] ss:$16 sps:$4 sm:$0xff]  }
  0xae   :  { %1530 = vmatprep.subr.bf16.mxu0 %v3359_v38  ;;  %1694 = vmatprep.subr.bf16.mxu1 %v3362_v39  ;;  %v3452_v38 = vld [vmem:[#allocation2 + $0x6cc] ss:$16 sps:$4 sm:$0xff]   ;;  %v3447_v39 = vld [vmem:[#allocation2 + $0x6c0] ss:$16 sps:$4 sm:$0xff]  }
  0xb1   :  { %1531 = vmatpush1.bf16.msra.mxu0 %v3357_v40  ;;  %1695 = vmatpush1.bf16.msra.mxu1 %v3360_v41  ;;  %v3450_v40 = vld [vmem:[#allocation2 + $0x6c8] ss:$16 sps:$4 sm:$0xff]   ;;  %v3455_v41 = vld [vmem:[#allocation2 + $0x6e4] ss:$16 sps:$4 sm:$0xff]  }
  0xb2   :  { %1532 = vmatprep.subr.bf16.mxu0 %v3365_v42  ;;  %1696 = vmatprep.subr.bf16.mxu1 %v3368_v43  ;;  %v3458_v42 = vld [vmem:[#allocation2 + $0x6ec] ss:$16 sps:$4 sm:$0xff]   ;;  %v3453_v43 = vld [vmem:[#allocation2 + $0x6e0] ss:$16 sps:$4 sm:$0xff]  }
  0xb5   :  { %1533 = vmatpush1.bf16.msra.mxu0 %v3363_v44  ;;  %1697 = vmatpush1.bf16.msra.mxu1 %v3366_v45  ;;  %v3456_v44 = vld [vmem:[#allocation2 + $0x6e8] ss:$16 sps:$4 sm:$0xff]   ;;  %v60_v45 = vld [vmem:[%s4095_s0 + $0x30] sm:$0xff] }
  0xb6   :  { %1534 = vmatprep.subr.bf16.mxu0 %v3371_v46  ;;  %1698 = vmatprep.subr.bf16.mxu1 %v3374_v47  ;;  %v3461_v46 = vld [vmem:[%s4098_s3 + $0x4] ss:$8 sps:$4 sm:$0xff]   ;;  %v67_v47 = vpack.c.bf16 %v60_v45, %v60_v45 }
  0xb9   :  { %1535 = vmatpush1.bf16.msra.mxu0 %v3369_v48  ;;  %1699 = vmatpush1.bf16.msra.mxu1 %v3372_v49  ;;  %v3459_v48 = vld [vmem:[%s4098_s3] ss:$8 sps:$4 sm:$0xff]   ;;  %v3464_v49 = vld [vmem:[%s4098_s3 + $0x14] ss:$8 sps:$4 sm:$0xff]  }
  0xba   :  { %1536 = vmatprep.subr.bf16.mxu0 %v3377_v50  ;;  %1700 = vmatprep.subr.bf16.mxu1 %v3380_v51  ;;  %v3462_v50 = vld [vmem:[%s4098_s3 + $0x10] ss:$8 sps:$4 sm:$0xff]   ;;  %v3467_v51 = vld [vmem:[%s4098_s3 + $0x24] ss:$8 sps:$4 sm:$0xff]  }
  0xbd   :  { %1537 = vmatpush1.bf16.msra.mxu0 %v3375_v52  ;;  %1701 = vmatpush1.bf16.msra.mxu1 %v3378_v53  ;;  %v3465_v52 = vld [vmem:[%s4098_s3 + $0x20] ss:$8 sps:$4 sm:$0xff]   ;;  %v3470_v53 = vld [vmem:[%s4098_s3 + $0x34] ss:$8 sps:$4 sm:$0xff]  }
  0xbe   :  { %1538 = vmatprep.subr.bf16.mxu0 %v3383_v54  ;;  %1702 = vmatprep.subr.bf16.mxu1 %v3386_v55  ;;  %v3468_v54 = vld [vmem:[%s4098_s3 + $0x30] ss:$8 sps:$4 sm:$0xff]   ;;  %v3473_v55 = vld [vmem:[%s4098_s3 + $0x44] ss:$8 sps:$4 sm:$0xff]  }
  0xc1   :  { %1539 = vmatpush1.bf16.msra.mxu0 %v3381_v56  ;;  %1703 = vmatpush1.bf16.msra.mxu1 %v3384_v57  ;;  %v3471_v56 = vld [vmem:[%s4098_s3 + $0x40] ss:$8 sps:$4 sm:$0xff]   ;;  %v3476_v57 = vld [vmem:[%s4098_s3 + $0x54] ss:$8 sps:$4 sm:$0xff]  }
  0xc2   :  { %1540 = vmatprep.subr.bf16.mxu0 %v3389_v58  ;;  %1704 = vmatprep.subr.bf16.mxu1 %v3392_v59  ;;  %v3474_v58 = vld [vmem:[%s4098_s3 + $0x50] ss:$8 sps:$4 sm:$0xff]   ;;  %v3479_v59 = vld [vmem:[%s4098_s3 + $0x64] ss:$8 sps:$4 sm:$0xff]  }
  0xc5   :  { %1541 = vmatpush1.bf16.msra.mxu0 %v3387_v60  ;;  %1705 = vmatpush1.bf16.msra.mxu1 %v3390_v61  ;;  %v3477_v60 = vld [vmem:[%s4098_s3 + $0x60] ss:$8 sps:$4 sm:$0xff]   ;;  %v3482_v61 = vld [vmem:[%s4098_s3 + $0x74] ss:$8 sps:$4 sm:$0xff]  }
  0xc6   :  { %1542 = vmatprep.subr.bf16.mxu0 %v3395_v62  ;;  %1706 = vmatprep.subr.bf16.mxu1 %v3398_v63  ;;  %v3480_v62 = vld [vmem:[%s4098_s3 + $0x70] ss:$8 sps:$4 sm:$0xff]   ;;  %v3485_v63 = vld [vmem:[%s4098_s3 + $0x84] ss:$8 sps:$4 sm:$0xff]  }
  0xc9   :  { %1543 = vmatpush1.bf16.msra.mxu0 %v3393_v0  ;;  %1707 = vmatpush1.bf16.msra.mxu1 %v3396_v1  ;;  %v3483_v0 = vld [vmem:[%s4098_s3 + $0x80] ss:$8 sps:$4 sm:$0xff]   ;;  %v3488_v1 = vld [vmem:[%s4098_s3 + $0x94] ss:$8 sps:$4 sm:$0xff]  }
  0xca   :  { %1544 = vmatprep.subr.bf16.mxu0 %v3401_v2  ;;  %1708 = vmatprep.subr.bf16.mxu1 %v3404_v3  ;;  %v3486_v2 = vld [vmem:[%s4098_s3 + $0x90] ss:$8 sps:$4 sm:$0xff]   ;;  %v3491_v3 = vld [vmem:[%s4098_s3 + $0xa4] ss:$8 sps:$4 sm:$0xff]  }
  0xcd   :  { %1545 = vmatpush1.bf16.msra.mxu0 %v3399_v4  ;;  %1709 = vmatpush1.bf16.msra.mxu1 %v3402_v5  ;;  %v3489_v4 = vld [vmem:[%s4098_s3 + $0xa0] ss:$8 sps:$4 sm:$0xff]   ;;  %v3494_v5 = vld [vmem:[%s4098_s3 + $0xb4] ss:$8 sps:$4 sm:$0xff]  }
  0xce   :  { %1546 = vmatprep.subr.bf16.mxu0 %v3407_v6  ;;  %1710 = vmatprep.subr.bf16.mxu1 %v3410_v7  ;;  %v3492_v6 = vld [vmem:[%s4098_s3 + $0xb0] ss:$8 sps:$4 sm:$0xff]   ;;  %v3497_v7 = vld [vmem:[%s4098_s3 + $0xc4] ss:$8 sps:$4 sm:$0xff]  }
  0xd1   :  { %1547 = vmatpush1.bf16.msra.mxu0 %v3405_v8  ;;  %1711 = vmatpush1.bf16.msra.mxu1 %v3408_v9  ;;  %v3495_v8 = vld [vmem:[%s4098_s3 + $0xc0] ss:$8 sps:$4 sm:$0xff]   ;;  %v3500_v9 = vld [vmem:[%s4098_s3 + $0xd4] ss:$8 sps:$4 sm:$0xff]  }
  0xd2   :  { %1557 = vmatprep.subr.bf16.mxu0 %v3413_v11  ;;  %1721 = vmatprep.subr.bf16.mxu1 %v3416_v12  ;;  %v3503_v11 = vld [vmem:[%s4098_s3 + $0xe4] ss:$8 sps:$4 sm:$0xff]   ;;  %v3501_v12 = vld [vmem:[%s4098_s3 + $0xe0] ss:$8 sps:$4 sm:$0xff]  }
  0xd4   :  { %1549 = vmatmul.mubr.bf16.vlgmr.msra.gmra.mrb[0].mxu0 %v65_v15  ;;  %1713 = vmatmul.mubr.bf16.vlgmr.msra.gmra.mrb[0].mxu1 %v65_v15  ;;  %v3509_v15 = vld [vmem:[%s4098_s3 + $0x104] ss:$8 sps:$4 sm:$0xff]  }
  0xd5   :  { %1558 = vmatpush1.bf16.msra.mxu0 %v3411_v13  ;;  %1722 = vmatpush1.bf16.msra.mxu1 %v3414_v14  ;;  %v3506_v13 = vld [vmem:[%s4098_s3 + $0xf4] ss:$8 sps:$4 sm:$0xff]   ;;  %v3504_v14 = vld [vmem:[%s4098_s3 + $0xf0] ss:$8 sps:$4 sm:$0xff]  }
  0xd6   :  { %1559 = vmatprep.subr.bf16.mxu0 %v3419_v16  ;;  %1723 = vmatprep.subr.bf16.mxu1 %v3422_v17  ;;  %v3555_v16 = vld [vmem:[%s4100_s5 + $0x40] sm:$0xff]  }
  0xd7   :  { %1589 = vmatprep.mubr.bf16.mxu0 %v3642_v24  ;;  %1753 = vmatprep.mubr.bf16.mxu1 %v3642_v24  ;;  %v3556_v17 = vld [vmem:[%s4100_s5] sm:$0xff]  }
  0xd8   :  { %v3563_v24 = vld [vmem:[%s4100_s5 + $0x60] sm:$0xff]  }
  0xd9   :  { %1560 = vmatpush1.bf16.msra.mxu0 %v3417_v18  ;;  %1724 = vmatpush1.bf16.msra.mxu1 %v3420_v19  ;;  %v3557_v18 = vld [vmem:[%s4100_s5 + $0x48] sm:$0xff]  }
  0xda   :  { %1561 = vmatprep.subr.bf16.mxu0 %v3425_v20  ;;  %1725 = vmatprep.subr.bf16.mxu1 %v3428_v21  ;;  %v3558_v19 = vld [vmem:[%s4100_s5 + $0x8] sm:$0xff]   ;;  %v3559_v20 = vld [vmem:[%s4100_s5 + $0x50] sm:$0xff]  }
  0xdb   :  { %v3560_v21 = vld [vmem:[%s4100_s5 + $0x10] sm:$0xff]  }
  0xdd   :  { %1562 = vmatpush1.bf16.msra.mxu0 %v3423_v22  ;;  %1726 = vmatpush1.bf16.msra.mxu1 %v3426_v23  ;;  %v3561_v22 = vld [vmem:[%s4100_s5 + $0x58] sm:$0xff]  }
  0xde   :  { %1563 = vmatprep.subr.bf16.mxu0 %v3431_v25  ;;  %1727 = vmatprep.subr.bf16.mxu1 %v3434_v26  ;;  %v3562_v23 = vld [vmem:[%s4100_s5 + $0x18] sm:$0xff]   ;;  %v3564_v25 = vld [vmem:[%s4100_s5 + $0x20] sm:$0xff]   ;;  %v3565_v26 = vld [vmem:[%s4100_s5 + $0x68] sm:$0xff]  }
  0xe1   :  { %1564 = vmatpush1.bf16.msra.mxu0 %v3429_v27  ;;  %1728 = vmatpush1.bf16.msra.mxu1 %v3432_v28  ;;  %v3566_v27 = vld [vmem:[%s4100_s5 + $0x28] sm:$0xff]   ;;  %v294_v28 = vlaneseq }
  0xe2   :  { %1565 = vmatprep.subr.bf16.mxu0 %v3437_v29  ;;  %1729 = vmatprep.subr.bf16.mxu1 %v3440_v30 }
  0xe3   :  { %v3874_v29 = vshrl.u32 %v294_v28, 7  ;;  %v3569_v28 = vld [vmem:[%s4100_s5 + $0x78] sm:$0xff]  }
  0xe5   :  { %1566 = vmatpush1.bf16.msra.mxu0 %v3435_v31  ;;  %1730 = vmatpush1.bf16.msra.mxu1 %v3438_v32  ;;  %v296_v30 = vsub.s32 0, %v3874_v29  ;;  %v3880_v31 = vld [vmem:[%s4097_s2] sm:$0xf]  ;;  %v300_v32 = vsub.s32 1, %v3874_v29 }
  0xe6   :  { %1567 = vmatprep.subr.bf16.mxu0 %v3443_v33  ;;  %1731 = vmatprep.subr.bf16.mxu1 %v3446_v34  ;;  %v308_v33 = vsub.s32 3, %v3874_v29 }
  0xe7   :  { %v297_v34 = vrot.slane %v3880_v31, %v296_v30 }
  0xe9   :  { %1568 = vmatpush1.bf16.msra.mxu0 %v3441_v35  ;;  %1732 = vmatpush1.bf16.msra.mxu1 %v3444_v36  ;;  %v301_v35 = vrot.slane %v3880_v31, %v300_v32  ;;  %v309_v36 = vrot.slane %v3880_v31, %v308_v33  ;;  %v3643_v33 = vmov 0.0  }
  0xea   :  { %1569 = vmatprep.subr.bf16.mxu0 %v3449_v37  ;;  %1733 = vmatprep.subr.bf16.mxu1 %v3452_v38 }
  0xed   :  { %1570 = vmatpush1.bf16.msra.mxu0 %v3447_v39  ;;  %1734 = vmatpush1.bf16.msra.mxu1 %v3450_v40 }
  0xee   :  { %1571 = vmatprep.subr.bf16.mxu0 %v3455_v41  ;;  %1735 = vmatprep.subr.bf16.mxu1 %v3458_v42 }
  0xf1   :  { %1572 = vmatpush1.bf16.msra.mxu0 %v3453_v43  ;;  %1736 = vmatpush1.bf16.msra.mxu1 %v3456_v44 }
  0xf2   :  { %2166 = vmatprep.subr.bf16.mxu0 %v3461_v46  ;;  %3002 = vmatprep.subr.bf16.mxu1 %v3555_v16  ;;  %v3548_v16 = vld [vmem:[%s4098_s3 + $0x1d4] ss:$8 sps:$4 sm:$0xff]  }
  0xf4   :  { %1590 = vmatmul.mubr.bf16.vlgmr.msra.gmra.mrb[0].mxu0 %v67_v47  ;;  %1754 = vmatmul.mubr.bf16.vlgmr.msra.gmra.mrb[0].mxu1 %v67_v47 }
  0xf5   :  { %2167 = vmatpush1.bf16.msra.mxu0 %v3459_v48  ;;  %3003 = vmatpush3.bf16.msra.mxu1 %v3556_v17  ;;  %v3546_v17 = vld [vmem:[%s4098_s3 + $0x1d0] ss:$8 sps:$4 sm:$0xff]  }
  0xf6   :  { %2168 = vmatprep.subr.bf16.mxu0 %v3464_v49  ;;  %3004 = vmatprep.subr.bf16.mxu1 %v3557_v18 }
  0xf9   :  { %2169 = vmatpush1.bf16.msra.mxu0 %v3462_v50  ;;  %3005 = vmatpush3.bf16.msra.mxu1 %v3558_v19  ;;  %v3551_v19 = vld [vmem:[%s4098_s3 + $0x1e4] ss:$8 sps:$4 sm:$0xff]  }
  0xfa   :  { %2170 = vmatprep.subr.bf16.mxu0 %v3467_v51  ;;  %3006 = vmatprep.subr.bf16.mxu1 %v3559_v20  ;;  %v3549_v20 = vld [vmem:[%s4098_s3 + $0x1e0] ss:$8 sps:$4 sm:$0xff]  }
  0xfd   :  { %2171 = vmatpush1.bf16.msra.mxu0 %v3465_v52  ;;  %3007 = vmatpush3.bf16.msra.mxu1 %v3560_v21  ;;  %v3507_v52 = vld [vmem:[%s4098_s3 + $0x100] ss:$8 sps:$4 sm:$0xff]  }
  0xfe   :  { %2172 = vmatprep.subr.bf16.mxu0 %v3470_v53  ;;  %3008 = vmatprep.subr.bf16.mxu1 %v3561_v22  ;;  %v3554_v22 = vld [vmem:[%s4098_s3 + $0x1f4] ss:$8 sps:$4 sm:$0xff]  }
 0x101   :  { %2173 = vmatpush1.bf16.msra.mxu0 %v3468_v54  ;;  %3009 = vmatpush3.bf16.msra.mxu1 %v3562_v23  ;;  %v3512_v54 = vld [vmem:[%s4098_s3 + $0x114] ss:$8 sps:$4 sm:$0xff]   ;;  %v3552_v23 = vld [vmem:[%s4098_s3 + $0x1f0] ss:$8 sps:$4 sm:$0xff]  }
 0x102   :  { %2174 = vmatprep.subr.bf16.mxu0 %v3473_v55  ;;  %3010 = vmatprep.subr.bf16.mxu1 %v3563_v24 }
 0x105   :  { %2175 = vmatpush1.bf16.msra.mxu0 %v3471_v56  ;;  %3011 = vmatpush3.bf16.msra.mxu1 %v3564_v25  ;;  %v3510_v56 = vld [vmem:[%s4098_s3 + $0x110] ss:$8 sps:$4 sm:$0xff]  }
 0x106   :  { %2176 = vmatprep.subr.bf16.mxu0 %v3476_v57  ;;  %3012 = vmatprep.subr.bf16.mxu1 %v3565_v26  ;;  %v3515_v57 = vld [vmem:[%s4098_s3 + $0x124] ss:$8 sps:$4 sm:$0xff]   ;;  %v3567_v26 = vld [vmem:[%s4100_s5 + $0x70] sm:$0xff]  }
 0x109   :  { %2177 = vmatpush1.bf16.msra.mxu0 %v3474_v58  ;;  %3013 = vmatpush3.bf16.msra.mxu1 %v3566_v27  ;;  %v3513_v58 = vld [vmem:[%s4098_s3 + $0x120] ss:$8 sps:$4 sm:$0xff]   ;;  %v3568_v27 = vld [vmem:[%s4100_s5 + $0x30] sm:$0xff]  }
 0x10a   :  { %2178 = vmatprep.subr.bf16.mxu0 %v3479_v59  ;;  %v3518_v59 = vld [vmem:[%s4098_s3 + $0x134] ss:$8 sps:$4 sm:$0xff]   ;;  %3014 = vmatprep.subr.bf16.mxu1 %v3567_v26 }
 0x10d   :  { %2179 = vmatpush1.bf16.msra.mxu0 %v3477_v60  ;;  %v3516_v60 = vld [vmem:[%s4098_s3 + $0x130] ss:$8 sps:$4 sm:$0xff]   ;;  %3015 = vmatpush3.bf16.msra.mxu1 %v3568_v27 }
 0x10e   :  { %2180 = vmatprep.subr.bf16.mxu0 %v3482_v61  ;;  %v3521_v61 = vld [vmem:[%s4098_s3 + $0x144] ss:$8 sps:$4 sm:$0xff]   ;;  %3016 = vmatprep.subr.bf16.mxu1 %v3569_v28 }
 0x111   :  { %2181 = vmatpush1.bf16.msra.mxu0 %v3480_v62  ;;  %v3519_v62 = vld [vmem:[%s4098_s3 + $0x140] ss:$8 sps:$4 sm:$0xff]  }
 0x112   :  { %2182 = vmatprep.subr.bf16.mxu0 %v3485_v63  ;;  %v3524_v63 = vld [vmem:[%s4098_s3 + $0x154] ss:$8 sps:$4 sm:$0xff]  }
 0x115   :  { %2183 = vmatpush1.bf16.msra.mxu0 %v3483_v0  ;;  %v3522_v0 = vld [vmem:[%s4098_s3 + $0x150] ss:$8 sps:$4 sm:$0xff]  }
 0x116   :  { %2184 = vmatprep.subr.bf16.mxu0 %v3488_v1  ;;  %v3527_v1 = vld [vmem:[%s4098_s3 + $0x164] ss:$8 sps:$4 sm:$0xff]  }
 0x119   :  { %2185 = vmatpush1.bf16.msra.mxu0 %v3486_v2  ;;  %v3525_v2 = vld [vmem:[%s4098_s3 + $0x160] ss:$8 sps:$4 sm:$0xff]  }
 0x11a   :  { %2186 = vmatprep.subr.bf16.mxu0 %v3491_v3  ;;  %v3530_v3 = vld [vmem:[%s4098_s3 + $0x174] ss:$8 sps:$4 sm:$0xff]  }
 0x11d   :  { %2187 = vmatpush1.bf16.msra.mxu0 %v3489_v4  ;;  %v3528_v4 = vld [vmem:[%s4098_s3 + $0x170] ss:$8 sps:$4 sm:$0xff]  }
 0x11e   :  { %2188 = vmatprep.subr.bf16.mxu0 %v3494_v5  ;;  %v3533_v5 = vld [vmem:[%s4098_s3 + $0x184] ss:$8 sps:$4 sm:$0xff]  }
 0x121   :  { %2189 = vmatpush1.bf16.msra.mxu0 %v3492_v6  ;;  %v3531_v6 = vld [vmem:[%s4098_s3 + $0x180] ss:$8 sps:$4 sm:$0xff]  }
 0x122   :  { %2190 = vmatprep.subr.bf16.mxu0 %v3497_v7  ;;  %v3536_v7 = vld [vmem:[%s4098_s3 + $0x194] ss:$8 sps:$4 sm:$0xff]  }
 0x125   :  { %2191 = vmatpush1.bf16.msra.mxu0 %v3495_v8  ;;  %v3534_v8 = vld [vmem:[%s4098_s3 + $0x190] ss:$8 sps:$4 sm:$0xff]  }
 0x126   :  { %2192 = vmatprep.subr.bf16.mxu0 %v3500_v9  ;;  %v3539_v9 = vld [vmem:[%s4098_s3 + $0x1a4] ss:$8 sps:$4 sm:$0xff]  }
 0x129   :  { %2193 = vmatpush1.bf16.msra.mxu0 %v3498_v10  ;;  %v3537_v10 = vld [vmem:[%s4098_s3 + $0x1a0] ss:$8 sps:$4 sm:$0xff]  }
 0x12a   :  { %2194 = vmatprep.subr.bf16.mxu0 %v3503_v11  ;;  %v3542_v11 = vld [vmem:[%s4098_s3 + $0x1b4] ss:$8 sps:$4 sm:$0xff]  }
 0x12d   :  { %2195 = vmatpush1.bf16.msra.mxu0 %v3501_v12  ;;  %v3540_v12 = vld [vmem:[%s4098_s3 + $0x1b0] ss:$8 sps:$4 sm:$0xff]  }
 0x12e   :  { %2196 = vmatprep.subr.bf16.mxu0 %v3506_v13  ;;  %v3545_v13 = vld [vmem:[%s4098_s3 + $0x1c4] ss:$8 sps:$4 sm:$0xff]  }
 0x131   :  { %2197 = vmatpush1.bf16.msra.mxu0 %v3504_v14  ;;  %v3543_v14 = vld [vmem:[%s4098_s3 + $0x1c0] ss:$8 sps:$4 sm:$0xff]  }
 0x132   :  { %2207 = vmatprep.subr.bf16.mxu0 %v3509_v15  ;;  %v304_v15 = vsub.s32 2, %v3874_v29  ;;  %v3572_v29 = vld [vmem:[%s4102_s7 + $0x8] sm:$0xff]  }
 0x134   :  { %v305_v18 = vrot.slane %v3880_v31, %v304_v15  ;;  %v3570_v31 = vld [vmem:[%s4100_s5 + $0x38] sm:$0xff]  }
 0x135   :  { %3017 = vmatpush3.bf16.msra.mxu1 %v3570_v31 }
 0x136   :  { %3042 = vmatprep.subr.bf16.mxu1 %v3643_v33 }
 0x1c7   :  { %v1591_v37 = vpop.f32.mrb[0].mxu0  ;;  %v3891_v38 = vpop.f32.mrb[0].mxu1 }
 0x1c8   :  { %v3082_v39 = vadd.f32 %v1591_v37, %v297_v34  ;;  %v1593_v40 = vpop.f32.mrb[1].mxu0  ;;  %v1757_v41 = vpop.f32.mrb[1].mxu1  ;;  %v3084_v21 = vadd.f32 %v3891_v38, %v305_v18  ;;  %v1834_v34 = vld [vmem:[%s4099_s4] sm:$0x3] }
 0x1c9   :  { %v3083_v42 = vadd.f32 %v1593_v40, %v301_v35  ;;  %v3085_v43 = vadd.f32 %v1757_v41, %v309_v36  ;;  %v1595_v44 = vpop.f32.mrb[2].mxu0  ;;  %v1759_v45 = vpop.f32.mrb[2].mxu1  ;;  %v1839_v35 = vrot.slane %v1834_v34, %v296_v30  ;;  %v1843_v36 = vrot.slane %v1834_v34, %v300_v32  ;;  %v3573_v30 = vld [vmem:[%s4102_s7 + $0x10] sm:$0xff]   ;;  %v3574_v32 = vld [vmem:[%s4102_s7 + $0x18] sm:$0xff]  }
 0x1ca   :  { %v1762_v46 = vmax.f32 %v3082_v39, 0.0  ;;  %v1596_v47 = vpop.f32.mrb[3].mxu0  ;;  %v1760_v48 = vpop.f32.mrb[3].mxu1  ;;  %v1764_v24 = vmax.f32 %v3084_v21, 0.0 }
 0x1cb   :  { %v1763_v49 = vmax.f32 %v3083_v42, 0.0  ;;  %v1765_v50 = vmax.f32 %v3085_v43, 0.0  ;;  %v3575_v48 = vld [vmem:[%s4102_s7 + $0x20] sm:$0xff]  }
 0x1cc   :  { %v1766_v53 = vpack.c.bf16 %v1762_v46, %v1762_v46  ;;  %v1768_v25 = vpack.c.bf16 %v1764_v24, %v1764_v24  ;;  %v3571_v46 = vld [vmem:[%s4102_s7] sm:$0xff]  }
 0x1cd   :  { %v1767_v51 = vpack.c.bf16 %v1763_v49, %v1763_v49  ;;  %v1769_v55 = vpack.c.bf16 %v1765_v50, %v1765_v50  ;;  %v3576_v49 = vld [vmem:[%s4102_s7 + $0x28] sm:$0xff]   ;;  %v3577_v50 = vld [vmem:[%s4102_s7 + $0x30] sm:$0xff]  }
 0x1cf   :  { %2198 = vmatprep.mubr.bf16.mxu0 %v1767_v51  ;;  %v3578_v51 = vld [vmem:[%s4102_s7 + $0x38] sm:$0xff]  }
 0x1d0   :  { %2199 = vmatmul.mubr.bf16.vlgmr.msra.gmra.mrb[4].mxu0 %v1766_v53  ;;  %v2967_v53 = vld [vmem:[%s4101_s6] ss:$0 sm:$0xff] }
 0x1d1   :  { %2208 = vmatpush1.bf16.msra.mxu0 %v3507_v52  ;;  %2239 = vmatprep.mubr.bf16.mxu0 %v1769_v55 }
 0x1d2   :  { %2209 = vmatprep.subr.bf16.mxu0 %v3512_v54 }
 0x1d5   :  { %2210 = vmatpush1.bf16.msra.mxu0 %v3510_v56 }
 0x1d6   :  { %2211 = vmatprep.subr.bf16.mxu0 %v3515_v57 }
 0x1d9   :  { %2212 = vmatpush1.bf16.msra.mxu0 %v3513_v58 }
 0x1da   :  { %2213 = vmatprep.subr.bf16.mxu0 %v3518_v59 }
 0x1dd   :  { %2214 = vmatpush1.bf16.msra.mxu0 %v3516_v60  ;;  %v3579_v60 = vld [vmem:[%s4104_s9] sm:$0xff]  }
 0x1de   :  { %2215 = vmatprep.subr.bf16.mxu0 %v3521_v61 }
 0x1e1   :  { %2216 = vmatpush1.bf16.msra.mxu0 %v3519_v62  ;;  %v3580_v62 = vld [vmem:[%s4104_s9 + $0x8] sm:$0xff]  }
 0x1e2   :  { %2217 = vmatprep.subr.bf16.mxu0 %v3524_v63  ;;  %v3581_v63 = vld [vmem:[%s4104_s9 + $0x10] sm:$0xff]  }
 0x1e5   :  { %2218 = vmatpush1.bf16.msra.mxu0 %v3522_v0  ;;  %v3582_v0 = vld [vmem:[%s4104_s9 + $0x18] sm:$0xff]  }
 0x1e6   :  { %2219 = vmatprep.subr.bf16.mxu0 %v3527_v1  ;;  %v3583_v1 = vld [vmem:[%s4104_s9 + $0x20] sm:$0xff]  }
 0x1e9   :  { %2220 = vmatpush1.bf16.msra.mxu0 %v3525_v2  ;;  %v3584_v2 = vld [vmem:[%s4104_s9 + $0x28] sm:$0xff]  }
 0x1ea   :  { %2221 = vmatprep.subr.bf16.mxu0 %v3530_v3  ;;  %v3585_v3 = vld [vmem:[%s4104_s9 + $0x30] sm:$0xff]  }
 0x1ed   :  { %2222 = vmatpush1.bf16.msra.mxu0 %v3528_v4  ;;  %v3586_v4 = vld [vmem:[%s4104_s9 + $0x38] sm:$0xff]  }
 0x1ee   :  { %2223 = vmatprep.subr.bf16.mxu0 %v3533_v5  ;;  %v2984_v5 = vld [vmem:[%s4103_s8] ss:$0 sm:$0xff]  ;;  %s3645_s8 = smov [#allocation5]  }
 0x1ef   :  { %s2670_s9 = sshll.u32 %s3645_s8, 4  ;;  %s2671_s9 = int_to_ptr.vmem [resolvable:$true] %s2670_s9 }
 0x1f0   :  { %p3618_p9 = scmp.lt.s32.totalorder %s2671_s9, %s2671_s9 }
 0x1f1   :  { %2224 = vmatpush1.bf16.msra.mxu0 %v3531_v6 }
 0x1f2   :  { %2225 = vmatprep.subr.bf16.mxu0 %v3536_v7 }
 0x1f5   :  { %2226 = vmatpush1.bf16.msra.mxu0 %v3534_v8 }
 0x1f6   :  { %2227 = vmatprep.subr.bf16.mxu0 %v3539_v9 }
 0x1f9   :  { %2228 = vmatpush1.bf16.msra.mxu0 %v3537_v10 }
 0x1fa   :  { %2229 = vmatprep.subr.bf16.mxu0 %v3542_v11 }
 0x1fd   :  { %2230 = vmatpush1.bf16.msra.mxu0 %v3540_v12 }
 0x1fe   :  { %2231 = vmatprep.subr.bf16.mxu0 %v3545_v13  ;;  %v2993_v13 = vld [vmem:[%s4105_s10] ss:$0 sm:$0xff]  ;;  %s3613_s10 = scalar_lea.vmem %s2671_s9, 128 }
 0x1ff   :  { %p3614_p8 = scmp.ne.s32.totalorder %s2671_s9, %s3613_s10  ;;  %p3619_p10 = scmp.lt.s32.totalorder %s3613_s10, %s3613_s10 }
 0x201   :  { %2232 = vmatpush1.bf16.msra.mxu0 %v3543_v14  ;;  %p3620_p11 = por %p3619_p10, %p3618_p9 }
 0x202   :  { %2233 = vmatprep.subr.bf16.mxu0 %v3548_v16 }
 0x203   :  { %p3621_p12 = pnand %p3620_p11, %p3614_p8 }
 0x205   :  { %2234 = vmatpush1.bf16.msra.mxu0 %v3546_v17 }
 0x206   :  { %2235 = vmatprep.subr.bf16.mxu0 %v3551_v19 }
 0x209   :  { %2236 = vmatpush1.bf16.msra.mxu0 %v3549_v20 }
 0x20a   :  { %2237 = vmatprep.subr.bf16.mxu0 %v3554_v22 }
 0x20d   :  { %2238 = vmatpush1.bf16.msra.mxu0 %v3552_v23 }
 0x210   :  { %2240 = vmatmul.mubr.bf16.vlgmr.msra.gmra.mrb[4].mxu0 %v1768_v25 }
 0x2e3   :  { %v2241_v37 = vpop.f32.mrb[4].mxu0 }
 0x2e4   :  { %v3086_v38 = vadd.f32 %v2241_v37, %v1839_v35  ;;  %v2243_v39 = vpop.f32.mrb[5].mxu0 }
 0x2e5   :  { %v3087_v40 = vadd.f32 %v2243_v39, %v1843_v36  ;;  %v2245_v41 = vpop.f32.mrb[6].mxu0 }
 0x2e6   :  { %v2248_v42 = vmax.f32 %v3086_v38, 0.0  ;;  %v2246_v43 = vpop.f32.mrb[7].mxu0 }
 0x2e7   :  { %v2249_v44 = vmax.f32 %v3087_v40, 0.0 }
 0x2e8   :  { %v2250_v47 = vpack.c.bf16 %v2248_v42, %v2248_v42 }
 0x2e9   :  { %v2251_v45 = vpack.c.bf16 %v2249_v44, %v2249_v44 }
 0x2eb   :  { %2419 = vmatprep.mubr.bf16.mxu1 %v2251_v45 }
 0x2ec   :  { %2420 = vmatmul.mubr.bf16.vlgmr.msra.gmra.mrb[4].mxu1 %v2250_v47 }
 0x2ed   :  { %3043 = vmatpush3.bf16.msra.mxu1 %v3571_v46  ;;  %3058 = vmatprep.mubr.msk.bf16.mxu1 %vm3644_vm0, %v3643_v33 }
 0x2ee   :  { %3044 = vmatprep.subr.bf16.mxu1 %v3643_v33 }
 0x2f1   :  { %3045 = vmatpush3.bf16.msra.mxu1 %v3572_v29 }
 0x2f2   :  { %3046 = vmatprep.subr.bf16.mxu1 %v3643_v33 }
 0x2f5   :  { %3047 = vmatpush3.bf16.msra.mxu1 %v3573_v30 }
 0x2f6   :  { %3048 = vmatprep.subr.bf16.mxu1 %v3643_v33 }
 0x2f9   :  { %3049 = vmatpush3.bf16.msra.mxu1 %v3574_v32 }
 0x2fa   :  { %3050 = vmatprep.subr.bf16.mxu1 %v3643_v33 }
 0x2fd   :  { %3051 = vmatpush3.bf16.msra.mxu1 %v3575_v48 }
 0x2fe   :  { %3052 = vmatprep.subr.bf16.mxu1 %v3643_v33 }
 0x301   :  { %3053 = vmatpush3.bf16.msra.mxu1 %v3576_v49 }
 0x302   :  { %3054 = vmatprep.subr.bf16.mxu1 %v3643_v33 }
 0x305   :  { %3055 = vmatpush3.bf16.msra.mxu1 %v3577_v50 }
 0x306   :  { %3056 = vmatprep.subr.bf16.mxu1 %v3643_v33 }
 0x309   :  { %3057 = vmatpush3.bf16.msra.mxu1 %v3578_v51 }
 0x30a   :  { %3062 = vmatprep.subr.bf16.mxu1 %v3643_v33 }
 0x3bf   :  { %v3018_v52 = vpop.f32.mrb[4].mxu1 }
 0x3c0   :  { %v3019_v54 = vpop.f32.mrb[5].mxu1 }
 0x3c1   :  { %v3020_v55 = vadd.f32 %v3019_v54, %v3018_v52  ;;  %v3021_v56 = vpop.f32.mrb[6].mxu1 }
 0x3c2   :  { %v3022_v57 = vpop.f32.mrb[7].mxu1 }
 0x3c3   :  { %v2422_v58 = vadd.f32 %v3020_v55, %v2967_v53 }
 0x3c5   :  { %v2427_v59 = vmax.f32 %v2422_v58, 0.0 }
 0x3c7   :  { %v2428_v61 = vpack.c.bf16 %v2427_v59, %v2427_v59 }
 0x3c9   :  { %3059 = vmatmul.mubr.bf16.vlgmr.msra.gmra.mrb[8].mxu1 %v2428_v61 }
 0x3ca   :  { %3063 = vmatpush3.bf16.msra.mxu1 %v3579_v60  ;;  %3078 = vmatprep.mubr.msk.bf16.mxu1 %vm3644_vm0, %v3643_v33 }
 0x3cb   :  { %3064 = vmatprep.subr.bf16.mxu1 %v3643_v33 }
 0x3ce   :  { %3065 = vmatpush3.bf16.msra.mxu1 %v3580_v62 }
 0x3cf   :  { %3066 = vmatprep.subr.bf16.mxu1 %v3643_v33 }
 0x3d2   :  { %3067 = vmatpush3.bf16.msra.mxu1 %v3581_v63 }
 0x3d3   :  { %3068 = vmatprep.subr.bf16.mxu1 %v3643_v33 }
 0x3d6   :  { %3069 = vmatpush3.bf16.msra.mxu1 %v3582_v0 }
 0x3d7   :  { %3070 = vmatprep.subr.bf16.mxu1 %v3643_v33 }
 0x3da   :  { %3071 = vmatpush3.bf16.msra.mxu1 %v3583_v1 }
 0x3db   :  { %3072 = vmatprep.subr.bf16.mxu1 %v3643_v33 }
 0x3de   :  { %3073 = vmatpush3.bf16.msra.mxu1 %v3584_v2 }
 0x3df   :  { %3074 = vmatprep.subr.bf16.mxu1 %v3643_v33 }
 0x3e2   :  { %3075 = vmatpush3.bf16.msra.mxu1 %v3585_v3 }
 0x3e3   :  { %3076 = vmatprep.subr.bf16.mxu1 %v3643_v33 }
 0x3e6   :  { %3077 = vmatpush3.bf16.msra.mxu1 %v3586_v4 }
 0x49c   :  { %v2534_v6 = vpop.f32.mrb[8].mxu1 }
 0x49d   :  { %v2535_v7 = vadd.f32 %v2984_v5, %v2534_v6  ;;  %v3060_v8 = vpop.f32.mrb[9].mxu1 }
 0x49e   :  { %v2537_v9 = vpop.f32.mrb[10].mxu1 }
 0x49f   :  { %v2540_v10 = vmax.f32 %v2535_v7, 0.0  ;;  %v3061_v11 = vpop.f32.mrb[11].mxu1 }
 0x4a1   :  { %v2541_v12 = vpack.c.bf16 %v2540_v10, %v2540_v10 }
 0x4a3   :  { %3079 = vmatmul.mubr.bf16.vlgmr.msra.gmra.mrb[12].mxu1 %v2541_v12 }
 0x576   :  { %v2647_v14 = vpop.f32.mrb[12].mxu1 }
 0x577   :  { %v2648_v15 = vadd.f32 %v2993_v13, %v2647_v14  ;;  %v3080_v16 = vpop.f32.mrb[13].mxu1 }
 0x578   :  { %v2650_v17 = vpop.f32.mrb[14].mxu1 }
 0x579   :  { %2653 = vmax.xlane.f32.xlu0 %v2648_v15  ;;  %v3081_v18 = vpop.f32.mrb[15].mxu1 }
 0x606   :  { %v2654_v19 = vpop.xlane.xlu0 %2653 }
 0x607   :  { %v2655_v20 = vsub.f32 %v2648_v15, %v2654_v19 }
 0x609   :  { %v2656_v21 = vmul.f32 1.442695, %v2655_v20 }
 0x60b   :  { %3587 = vpow2.f32 %v2656_v21 }
 0x615   :  { %v3588_v22 = vpop.eup %3587 }
 0x616   :  { %2658 = vadd.xlane.f32.xlu0 %v3588_v22 }
 0x6a3   :  { %v2659_v23 = vpop.xlane.xlu0 %2658 }
 0x6a4   :  { %3589 = vlog2.f32 %v2659_v23 }
 0x6ae   :  { %v3590_v24 = vpop.eup %3589 }
 0x6af   :  { %v2661_v25 = vmul.f32 0.6931472, %v3590_v24 }
 0x6b1   :  { %v2662_v26 = vsub.f32 %v2655_v20, %v2661_v25 }
 0x6b3   :  { %2663 = vst [vmem:[#allocation5] sm:$0xff] %v2662_v26 }
 0x6b4   :  { %3624 = shalt.err (!%p3621_p12)
}
 0x6b5   :  { %s3625_s27 = scalar_lea.hbm %s4106_s11, 128 }
 0x6b6   :  { %p3626_p13 = scmp.ne.s32.totalorder %s4106_s11, %s3625_s27  ;;  %p3629_p0 = scmp.lt.u32.totalorder %s3625_s27, %s4106_s11 }
 0x6b8   :  { %p3631_p1 = pnand %p3629_p0, %p3626_p13 }
 0x6ba   :  { %3634 = shalt.err (!%p3631_p1)
}
 0x6bb   :  { %2673 = dma.vmem_to_hbm [thread:$0]  %s2671_s9, 128, %s4106_s11, [#allocation4]  }
 0x6bc   :  { %3637 = dma.done.wait [#allocation4], 128  }
 0x6bd   :  { %3638 = vsyncadd [#allocation4], 4294967168 }
 0x6be   :  { %2677 = vsyncpa [#allocation3], 1 }
 0x6bf   :  { %2678 = vsyncpa [#allocation4], 1 }

</bundles_post_ra>
